<compile_context>
chip_gen: v5e
topology: v5e:2x2
jax: 0.10.0
libtpu: 0.0.40
codegen_flags: <defaults>
</compile_context>

<pallas_src>
import jax
import jax.numpy as jnp
from jax.experimental import pallas as pl
from jax.experimental.pallas import tpu as pltpu

# ---- problem geometry -------------------------------------------------------
N_BATCH = 2
C_IN = 128
H, W = 6, 7
S = H * W                  # 42 spatial positions
C_POL = 32                 # policy-head conv channels
C_VAL = 3                  # value-head conv channels
C_VAL_PAD = 8              # value channels padded to 8 (zero-filled)
C_OUT = C_POL + C_VAL_PAD  # 40 fused conv output channels
HID = 32                   # value fc1 hidden size
N_MOVES = 7
BN_EPS = 1e-5
OUT_LANES = 128            # lane-dense packed output row width

# small-parameter slab rows (shape (8, 128) f32)
ROW_CBIAS = 0              # lanes 0:40 : fused folded conv bias (policy 0:32, value 32:35)
ROW_FC1B = 1               # lanes 0:32 : fc1 bias
ROW_FC2W = 2               # lanes 0:32 : fc2 weight
ROW_FCB = 3                # lanes 0:7  : policy fc bias
ROW_FC2B = 4               # lane 0     : fc2 bias
SLAB_ROWS = 8

# Default batch tile: ~8.5 MB peak VMEM (inputs + spilled intermediates), fits the
# default scoped VMEM on v5e (16 MiB), v6e (32 MiB) and v7x (32 of 64 MiB).  Larger
# tiles (128-256) are fine on v6e/v7x; raise vmem_limit_bytes if you go bigger.
DEFAULT_B_TILE = 64


def _output_block_kernel(x_ref, wconv_ref, wp_ref, wv_ref, slab_ref, out_ref):
    # One grid step == one batch tile of B samples.
    x3 = x_ref[0]                                                   # (S, B, 128) bf16

    # ---- fused 1x1 convs (BN folded) + ReLU: one batched MXU matmul, K = 128 ----
    feat = jnp.einsum("sbc,soc->sbo", x3, wconv_ref[...],
                      preferred_element_type=jnp.float32)           # (S, B, 40) f32
    feat = jnp.maximum(feat + slab_ref[ROW_CBIAS:ROW_CBIAS + 1, 0:C_OUT], 0.0)

    pfeat = feat[:, :, 0:C_POL]                                     # (S, B, 32)
    vfeat = feat[:, :, C_POL:C_OUT]                                 # (S, B, 8) (chans 3:8 == 0)

    # ---- policy head: fc (1344 -> 7) as batched matmul over s, summed over s ----
    p_part = jnp.einsum("sbo,smo->sbm", pfeat, wp_ref[...],
                        preferred_element_type=jnp.float32)         # (S, B, 7)
    logits = jnp.sum(p_part, axis=0) + slab_ref[ROW_FCB:ROW_FCB + 1, 0:N_MOVES]  # (B, 7)
    m = jnp.max(logits, axis=1, keepdims=True)
    e = jnp.exp(logits - m)
    pol = e * pl.reciprocal(jnp.sum(e, axis=1, keepdims=True), approx=True)      # (B, 7)

    # ---- value head: fc1 (126 -> 32) -> ReLU -> fc2 (32 -> 1) -> tanh ----
    v_part = jnp.einsum("sbo,soh->sbh", vfeat, wv_ref[...],
                        preferred_element_type=jnp.float32)         # (S, B, 32)
    r1 = jnp.maximum(jnp.sum(v_part, axis=0)
                     + slab_ref[ROW_FC1B:ROW_FC1B + 1, 0:HID], 0.0)               # (B, 32)
    v_pre = jnp.sum(r1 * slab_ref[ROW_FC2W:ROW_FC2W + 1, 0:HID],
                    axis=1, keepdims=True) + slab_ref[ROW_FC2B:ROW_FC2B + 1, 0:1]  # (B, 1)
    val = jnp.tanh(v_pre)

    # lane-dense packed output row: lanes 0:7 = policy probs, lane 7 = value
    out_ref[0, :, 0:N_MOVES] = pol
    out_ref[0, :, N_MOVES:N_MOVES + 1] = val


def _fold_bn(conv_w, conv_b, g, b, m, v):
    """Fold eval-mode BatchNorm into a 1x1 conv weight (Cout, Cin) and bias (Cout,)."""
    sc = g * jax.lax.rsqrt(v + BN_EPS)
    return conv_w * sc[:, None], (conv_b - m) * sc + b


def output_block_forward(x_nchw, P, *, b_tile=DEFAULT_B_TILE):
    """x_nchw: (N, 128, 6, 7) float32 -> (policy (N, 7), value (N, 1))."""
    N = x_nchw.shape[0]

    bt = b_tile
    if N < bt:
        bt = ((N + 7) // 8) * 8          # shrink tile for tiny batches
    bt = max(bt, 8)
    assert bt % 8 == 0
    n_tiles = (N + bt - 1) // bt
    n_pad = n_tiles * bt

    x = x_nchw.astype(jnp.float32)
    if n_pad != N:
        x = jnp.pad(x, ((0, n_pad - N), (0, 0), (0, 0), (0, 0)))

    # single fused relayout+cast: (Npad,128,6,7) -> (tiles, S, bt, 128) bf16
    # TODO(synk): emit this layout directly from the residual tower to drop this pass.
    xp = x.reshape(n_tiles, bt, C_IN, S)
    xp = jnp.transpose(xp, (0, 3, 1, 2)).astype(jnp.bfloat16)        # (tiles, 42, bt, 128)

    # ---- fold eval-mode BN into the 1x1 convs, fuse both heads into one weight ----
    wp_w, bp = _fold_bn(P["conv1_w"], P["conv1_b"],
                        P["bn1_g"], P["bn1_b"], P["bn1_m"], P["bn1_v"])   # (32,128),(32,)
    wv_w, bv = _fold_bn(P["conv_w"], P["conv_b"],
                        P["bn_g"], P["bn_b"], P["bn_m"], P["bn_v"])       # (3,128),(3,)
    wconv = jnp.zeros((C_OUT, C_IN), jnp.float32)
    wconv = wconv.at[0:C_POL].set(wp_w)
    wconv = wconv.at[C_POL:C_POL + C_VAL].set(wv_w)
    wconv_t = jnp.broadcast_to(wconv.astype(jnp.bfloat16)[None],
                               (S, C_OUT, C_IN))                          # (42, 40, 128)

    # FC weights rearranged to [s, out, in] / [s, in, out] to match the kernel's
    # (s, b, chan) activations (PyTorch flatten order of (N, C, H, W) is c*42 + s).
    wp3 = P["fc_w"].reshape(N_MOVES, C_POL, S).transpose(2, 0, 1)         # (42, 7, 32)
    wv3 = jnp.zeros((S, C_VAL_PAD, HID), jnp.float32)
    wv3 = wv3.at[:, 0:C_VAL, :].set(
        P["fc1_w"].reshape(HID, C_VAL, S).transpose(2, 1, 0))             # (42, 8, 32)

    # remaining small parameters packed into a single (8,128) slab -> one tiny DMA
    slab = jnp.zeros((SLAB_ROWS, 128), jnp.float32)
    slab = slab.at[ROW_CBIAS, 0:C_POL].set(bp)
    slab = slab.at[ROW_CBIAS, C_POL:C_POL + C_VAL].set(bv)
    slab = slab.at[ROW_FC1B, 0:HID].set(P["fc1_b"])
    slab = slab.at[ROW_FC2W, 0:HID].set(P["fc2_w"].reshape(HID))
    slab = slab.at[ROW_FCB, 0:N_MOVES].set(P["fc_b"])
    slab = slab.at[ROW_FC2B, 0].set(P["fc2_b"][0])

    out = pl.pallas_call(
        _output_block_kernel,
        out_shape=jax.ShapeDtypeStruct((n_tiles, bt, OUT_LANES), jnp.float32),
        grid=(n_tiles,),
        in_specs=[
            pl.BlockSpec((1, S, bt, C_IN), lambda n: (n, 0, 0, 0)),       # x (batch tile)
            pl.BlockSpec((S, C_OUT, C_IN), lambda n: (0, 0, 0)),          # fused conv weight
            pl.BlockSpec((S, N_MOVES, C_POL), lambda n: (0, 0, 0)),       # policy fc weight
            pl.BlockSpec((S, C_VAL_PAD, HID), lambda n: (0, 0, 0)),       # value fc1 weight
            pl.BlockSpec((SLAB_ROWS, 128), lambda n: (0, 0)),             # small-param slab
        ],
        out_specs=pl.BlockSpec((1, bt, OUT_LANES), lambda n: (n, 0, 0)),
        compiler_params=pltpu.CompilerParams(
            dimension_semantics=("parallel",)),
    )(xp, wconv_t, wp3, wv3, slab)

    out = out.reshape(n_pad, OUT_LANES)[:N]
    policy = out[:, 0:N_MOVES]                                            # (N, 7)
    value = out[:, N_MOVES:N_MOVES + 1]                                   # (N, 1)
    return policy, value


def init_params(key):
    ks = jax.random.split(key, 16)
    p = {
        # nn.Conv2d(128, 3, 1): weight (3,128,1,1) -> (3,128), bias (3,)
        "conv_w": 0.05 * jax.random.normal(ks[0], (C_VAL, C_IN), jnp.float32),
        "conv_b": 0.05 * jax.random.normal(ks[1], (C_VAL,), jnp.float32),
        # nn.BatchNorm2d(3) (inference-mode running stats)
        "bn_g": 1.0 + 0.1 * jax.random.normal(ks[2], (C_VAL,), jnp.float32),
        "bn_b": 0.1 * jax.random.normal(ks[3], (C_VAL,), jnp.float32),
        "bn_m": 0.05 * jax.random.normal(ks[4], (C_VAL,), jnp.float32),
        "bn_v": 1.0 + 0.1 * jax.random.uniform(ks[5], (C_VAL,), jnp.float32),
        # nn.Linear(3*6*7, 32)
        "fc1_w": 0.05 * jax.random.normal(ks[6], (HID, C_VAL * S), jnp.float32),
        "fc1_b": 0.05 * jax.random.normal(ks[7], (HID,), jnp.float32),
        # nn.Linear(32, 1)
        "fc2_w": 0.05 * jax.random.normal(ks[8], (1, HID), jnp.float32),
        "fc2_b": 0.05 * jax.random.normal(ks[9], (1,), jnp.float32),
        # nn.Conv2d(128, 32, 1)
        "conv1_w": 0.05 * jax.random.normal(ks[10], (C_POL, C_IN), jnp.float32),
        "conv1_b": 0.05 * jax.random.normal(ks[11], (C_POL,), jnp.float32),
        # nn.BatchNorm2d(32)
        "bn1_g": 1.0 + 0.1 * jax.random.normal(ks[12], (C_POL,), jnp.float32),
        "bn1_b": 0.1 * jax.random.normal(ks[13], (C_POL,), jnp.float32),
        "bn1_m": 0.05 * jax.random.normal(ks[14], (C_POL,), jnp.float32),
        "bn1_v": 1.0 + 0.1 * jax.random.uniform(ks[15], (C_POL,), jnp.float32),
        # nn.Linear(6*7*32, 7)
        "fc_w": 0.02 * jax.random.normal(jax.random.fold_in(key, 99),
                                         (N_MOVES, C_POL * S), jnp.float32),
        "fc_b": 0.02 * jax.random.normal(jax.random.fold_in(key, 100),
                                         (N_MOVES,), jnp.float32),
    }
    return p


def reference_forward(x_nchw, P):
    """Pure-JAX reference mirroring the PyTorch forward (eval-mode BN)."""
    N = x_nchw.shape[0]
    x = x_nchw.reshape(N, C_IN, S).astype(jnp.float32)
    hi = jax.lax.Precision.HIGHEST

    def bn(y, g, b, m, v):
        return (y - m[None, :, None]) * (g * jax.lax.rsqrt(v + BN_EPS))[None, :, None] \
               + b[None, :, None]

    v = jnp.einsum("oc,ncs->nos", P["conv_w"], x, precision=hi) \
        + P["conv_b"][None, :, None]
    v = jax.nn.relu(bn(v, P["bn_g"], P["bn_b"], P["bn_m"], P["bn_v"]))
    vf = v.reshape(N, C_VAL * S)
    r1 = jax.nn.relu(jnp.dot(vf, P["fc1_w"].T, precision=hi) + P["fc1_b"])
    val = jnp.tanh(jnp.dot(r1, P["fc2_w"].T, precision=hi) + P["fc2_b"])

    p = jnp.einsum("oc,ncs->nos", P["conv1_w"], x, precision=hi) \
        + P["conv1_b"][None, :, None]
    p = jax.nn.relu(bn(p, P["bn1_g"], P["bn1_b"], P["bn1_m"], P["bn1_v"]))
    pf = p.reshape(N, C_POL * S)
    logits = jnp.dot(pf, P["fc_w"].T, precision=hi) + P["fc_b"]
    pol = jnp.exp(jax.nn.log_softmax(logits, axis=1))
    return pol, val


if __name__ == "__main__":
    key = jax.random.PRNGKey(0)
    k_x, k_p = jax.random.split(key)
    x = jax.random.normal(k_x, (N_BATCH, C_IN, H, W), jnp.float32)
    params = init_params(k_p)

    policy, value = output_block_forward(x, params)
    policy = jax.block_until_ready(policy)
    value = jax.block_until_ready(value)

    ref_policy, ref_value = reference_forward(x, params)

    assert policy.shape == (N_BATCH, N_MOVES) and value.shape == (N_BATCH, 1)
    assert jnp.allclose(policy, ref_policy, atol=2e-3, rtol=2e-3), "policy mismatch"
    assert jnp.allclose(value, ref_value, atol=2e-3, rtol=2e-3), "value mismatch"

    print("KERNEL_OK")
</pallas_src>

<mosaic_0001>
module attributes {stable_mosaic.version = 11 : i64} {
  func.func @_output_block_kernel(%arg0: i32, %arg1: memref<1x42x8x128xbf16, #tpu.memory_space<vmem>>, %arg2: memref<42x40x128xbf16, #tpu.memory_space<vmem>>, %arg3: memref<42x7x32xf32, #tpu.memory_space<vmem>>, %arg4: memref<42x8x32xf32, #tpu.memory_space<vmem>>, %arg5: memref<8x128xf32, #tpu.memory_space<vmem>>, %arg6: memref<1x8x128xf32, #tpu.memory_space<vmem>>) attributes {dimension_semantics = [#tpu.dimension_semantics<parallel>], iteration_bounds = array<i64: 1>, scalar_prefetch = 0 : i64, scratch_operands = 0 : i64, tpu.core_type = #tpu.core_type<tc>, window_params = [{transform_indices = @transform_0, window_bounds = array<i64: 1, 42, 8, 128>}, {pipeline_mode = #tpu.pipeline_mode<synchronous>, transform_indices = @transform_1, window_bounds = array<i64: 42, 40, 128>}, {pipeline_mode = #tpu.pipeline_mode<synchronous>, transform_indices = @transform_2, window_bounds = array<i64: 42, 7, 32>}, {pipeline_mode = #tpu.pipeline_mode<synchronous>, transform_indices = @transform_3, window_bounds = array<i64: 42, 8, 32>}, {pipeline_mode = #tpu.pipeline_mode<synchronous>, transform_indices = @transform_4, window_bounds = array<i64: 8, 128>}, {transform_indices = @transform_5, window_bounds = array<i64: 1, 8, 128>}]} {
    %c0 = arith.constant 0 : index
    %c0_0 = arith.constant 0 : index
    %c0_1 = arith.constant 0 : index
    %c0_2 = arith.constant 0 : index
    %0 = vector.load %arg1[%c0, %c0_0, %c0_1, %c0_2] : memref<1x42x8x128xbf16, #tpu.memory_space<vmem>>, vector<1x42x8x128xbf16>
    %1 = vector.shape_cast %0 : vector<1x42x8x128xbf16> to vector<42x8x128xbf16>
    %c0_3 = arith.constant 0 : index
    %c0_4 = arith.constant 0 : index
    %c0_5 = arith.constant 0 : index
    %2 = vector.load %arg2[%c0_3, %c0_4, %c0_5] : memref<42x40x128xbf16, #tpu.memory_space<vmem>>, vector<42x40x128xbf16>
    "tpu.trace_start"() <{level = 10 : i32, message = "sbc,soc->sbo"}> : () -> ()
    %cst = arith.constant dense<0.000000e+00> : vector<42x8x40xf32>
    %3 = tpu.matmul %1, %2, %cst {dimension_numbers = #tpu.dot_dimension_numbers<[2], [2], [1], [1], [0, 0, 0, 1, 1, 1], [0], [0]>} : vector<42x8x128xbf16>, vector<42x40x128xbf16>, vector<42x8x40xf32> -> vector<42x8x40xf32>
    "tpu.trace_stop"() : () -> ()
    %c0_6 = arith.constant 0 : index
    %c0_7 = arith.constant 0 : index
    %4 = vector.load %arg5[%c0_6, %c0_7] : memref<8x128xf32, #tpu.memory_space<vmem>>, vector<1x40xf32>
    %5 = vector.shape_cast %4 : vector<1x40xf32> to vector<1x1x40xf32>
    %6 = vector.broadcast %5 : vector<1x1x40xf32> to vector<42x8x40xf32>
    %7 = arith.addf %3, %6 : vector<42x8x40xf32>
    %cst_8 = arith.constant 0.000000e+00 : f32
    %8 = vector.broadcast %cst_8 : f32 to vector<42x8x40xf32>
    %9 = arith.maximumf %7, %8 : vector<42x8x40xf32>
    %10 = vector.extract_strided_slice %9 {offsets = [0, 0, 0], sizes = [42, 8, 32], strides = [1, 1, 1]} : vector<42x8x40xf32> to vector<42x8x32xf32>
    %11 = vector.extract_strided_slice %9 {offsets = [0, 0, 32], sizes = [42, 8, 8], strides = [1, 1, 1]} : vector<42x8x40xf32> to vector<42x8x8xf32>
    %c0_9 = arith.constant 0 : index
    %c0_10 = arith.constant 0 : index
    %c0_11 = arith.constant 0 : index
    %12 = vector.load %arg3[%c0_9, %c0_10, %c0_11] : memref<42x7x32xf32, #tpu.memory_space<vmem>>, vector<42x7x32xf32>
    "tpu.trace_start"() <{level = 10 : i32, message = "sbo,smo->sbm"}> : () -> ()
    %cst_12 = arith.constant dense<0.000000e+00> : vector<42x8x7xf32>
    %13 = tpu.matmul %10, %12, %cst_12 {dimension_numbers = #tpu.dot_dimension_numbers<[2], [2], [1], [1], [0, 0, 0, 1, 1, 1], [0], [0]>} : vector<42x8x32xf32>, vector<42x7x32xf32>, vector<42x8x7xf32> -> vector<42x8x7xf32>
    "tpu.trace_stop"() : () -> ()
    %cst_13 = arith.constant dense<0.000000e+00> : vector<8x7xf32>
    %14 = vector.multi_reduction <add>, %13, %cst_13 [0] : vector<42x8x7xf32> to vector<8x7xf32>
    %c3 = arith.constant 3 : index
    %c0_14 = arith.constant 0 : index
    %15 = vector.load %arg5[%c3, %c0_14] : memref<8x128xf32, #tpu.memory_space<vmem>>, vector<1x7xf32>
    %16 = vector.broadcast %15 : vector<1x7xf32> to vector<8x7xf32>
    %17 = arith.addf %14, %16 : vector<8x7xf32>
    %cst_15 = arith.constant dense<0xFF800000> : vector<8xf32>
    %18 = vector.multi_reduction <maximumf>, %17, %cst_15 [1] : vector<8x7xf32> to vector<8xf32>
    %19 = vector.shape_cast %18 : vector<8xf32> to vector<8x1xf32>
    %20 = vector.broadcast %19 : vector<8x1xf32> to vector<8x7xf32>
    %21 = arith.subf %17, %20 : vector<8x7xf32>
    %22 = math.exp %21 : vector<8x7xf32>
    %cst_16 = arith.constant dense<0.000000e+00> : vector<8xf32>
    %23 = vector.multi_reduction <add>, %22, %cst_16 [1] : vector<8x7xf32> to vector<8xf32>
    %24 = vector.shape_cast %23 : vector<8xf32> to vector<8x1xf32>
    %25 = tpu.reciprocal %24 {approx = true} : vector<8x1xf32> -> vector<8x1xf32>
    %26 = vector.broadcast %25 : vector<8x1xf32> to vector<8x7xf32>
    %27 = arith.mulf %22, %26 : vector<8x7xf32>
    %c0_17 = arith.constant 0 : index
    %c0_18 = arith.constant 0 : index
    %c0_19 = arith.constant 0 : index
    %28 = vector.load %arg4[%c0_17, %c0_18, %c0_19] : memref<42x8x32xf32, #tpu.memory_space<vmem>>, vector<42x8x32xf32>
    "tpu.trace_start"() <{level = 10 : i32, message = "sbo,soh->sbh"}> : () -> ()
    %cst_20 = arith.constant dense<0.000000e+00> : vector<42x8x32xf32>
    %29 = tpu.matmul %11, %28, %cst_20 {dimension_numbers = #tpu.dot_dimension_numbers<[2], [1], [1], [2], [0, 0, 0, 1, 1, 2], [0], [0]>} : vector<42x8x8xf32>, vector<42x8x32xf32>, vector<42x8x32xf32> -> vector<42x8x32xf32>
    "tpu.trace_stop"() : () -> ()
    %cst_21 = arith.constant dense<0.000000e+00> : vector<8x32xf32>
    %30 = vector.multi_reduction <add>, %29, %cst_21 [0] : vector<42x8x32xf32> to vector<8x32xf32>
    %c1 = arith.constant 1 : index
    %c0_22 = arith.constant 0 : index
    %31 = vector.load %arg5[%c1, %c0_22] : memref<8x128xf32, #tpu.memory_space<vmem>>, vector<1x32xf32>
    %32 = vector.broadcast %31 : vector<1x32xf32> to vector<8x32xf32>
    %33 = arith.addf %30, %32 : vector<8x32xf32>
    %cst_23 = arith.constant 0.000000e+00 : f32
    %34 = vector.broadcast %cst_23 : f32 to vector<8x32xf32>
    %35 = arith.maximumf %33, %34 : vector<8x32xf32>
    %c2 = arith.constant 2 : index
    %c0_24 = arith.constant 0 : index
    %36 = vector.load %arg5[%c2, %c0_24] : memref<8x128xf32, #tpu.memory_space<vmem>>, vector<1x32xf32>
    %37 = vector.broadcast %36 : vector<1x32xf32> to vector<8x32xf32>
    %38 = arith.mulf %35, %37 : vector<8x32xf32>
    %cst_25 = arith.constant dense<0.000000e+00> : vector<8xf32>
    %39 = vector.multi_reduction <add>, %38, %cst_25 [1] : vector<8x32xf32> to vector<8xf32>
    %40 = vector.shape_cast %39 : vector<8xf32> to vector<8x1xf32>
    %c4 = arith.constant 4 : index
    %c0_26 = arith.constant 0 : index
    %41 = vector.load %arg5[%c4, %c0_26] : memref<8x128xf32, #tpu.memory_space<vmem>>, vector<1x1xf32>
    %42 = vector.broadcast %41 : vector<1x1xf32> to vector<8x1xf32>
    %43 = arith.addf %40, %42 : vector<8x1xf32>
    %44 = math.tanh %43 : vector<8x1xf32>
    %c0_27 = arith.constant 0 : index
    %c0_28 = arith.constant 0 : index
    %c0_29 = arith.constant 0 : index
    %45 = vector.load %arg6[%c0_27, %c0_28, %c0_29] : memref<1x8x128xf32, #tpu.memory_space<vmem>>, vector<1x8x7xf32>
    %46 = vector.shape_cast %45 : vector<1x8x7xf32> to vector<8x7xf32>
    %47 = vector.shape_cast %27 : vector<8x7xf32> to vector<1x8x7xf32>
    tpu.vector_store %arg6[%c0_27, %c0_28, %c0_29], %47 {strides = array<i32>} : memref<1x8x128xf32, #tpu.memory_space<vmem>>, vector<1x8x7xf32>,
    %c0_30 = arith.constant 0 : index
    %c0_31 = arith.constant 0 : index
    %c7 = arith.constant 7 : index
    %48 = vector.load %arg6[%c0_30, %c0_31, %c7] : memref<1x8x128xf32, #tpu.memory_space<vmem>>, vector<1x8x1xf32>
    %49 = vector.shape_cast %48 : vector<1x8x1xf32> to vector<8x1xf32>
    %50 = vector.shape_cast %44 : vector<8x1xf32> to vector<1x8x1xf32>
    tpu.vector_store %arg6[%c0_30, %c0_31, %c7], %50 {strides = array<i32>} : memref<1x8x128xf32, #tpu.memory_space<vmem>>, vector<1x8x1xf32>,
    return
  }
  func.func @transform_0(%arg0: i32) -> (i32, i32, i32, i32) {
    %c0_i32 = arith.constant 0 : i32
    %c0_i32_0 = arith.constant 0 : i32
    %c0_i32_1 = arith.constant 0 : i32
    %c0_i32_2 = arith.constant 0 : i32
    return %arg0, %c0_i32, %c0_i32_0, %c0_i32_1 : i32, i32, i32, i32
  }
  func.func @transform_1(%arg0: i32) -> (i32, i32, i32) {
    %c0_i32 = arith.constant 0 : i32
    %c0_i32_0 = arith.constant 0 : i32
    %c0_i32_1 = arith.constant 0 : i32
    %c0_i32_2 = arith.constant 0 : i32
    return %c0_i32, %c0_i32_0, %c0_i32_1 : i32, i32, i32
  }
  func.func @transform_2(%arg0: i32) -> (i32, i32, i32) {
    %c0_i32 = arith.constant 0 : i32
    %c0_i32_0 = arith.constant 0 : i32
    %c0_i32_1 = arith.constant 0 : i32
    %c0_i32_2 = arith.constant 0 : i32
    return %c0_i32, %c0_i32_0, %c0_i32_1 : i32, i32, i32
  }
  func.func @transform_3(%arg0: i32) -> (i32, i32, i32) {
    %c0_i32 = arith.constant 0 : i32
    %c0_i32_0 = arith.constant 0 : i32
    %c0_i32_1 = arith.constant 0 : i32
    %c0_i32_2 = arith.constant 0 : i32
    return %c0_i32, %c0_i32_0, %c0_i32_1 : i32, i32, i32
  }
  func.func @transform_4(%arg0: i32) -> (i32, i32) {
    %c0_i32 = arith.constant 0 : i32
    %c0_i32_0 = arith.constant 0 : i32
    %c0_i32_1 = arith.constant 0 : i32
    return %c0_i32, %c0_i32_0 : i32, i32
  }
  func.func @transform_5(%arg0: i32) -> (i32, i32, i32) {
    %c0_i32 = arith.constant 0 : i32
    %c0_i32_0 = arith.constant 0 : i32
    %c0_i32_1 = arith.constant 0 : i32
    return %arg0, %c0_i32, %c0_i32_0 : i32, i32, i32
  }
}

</mosaic_0001>

<bundles_post_ra>
// kernel: tpu_custom_call.1
= control target key start
LH: loop header
LB: loop body
LE: loop exit
PB: predicated region body
PF: predicated region fallthrough
CT: control target
= control target key end

     0   :  { %10 = vsyncpa [#allocation3], 0  ;;  %s5691_s0 = inlined_call_operand.hbm [shape: bf16[1,42,8,128], index: 0, kind: input, shape index: {}]   ;;  %s5692_s1 = inlined_call_operand.vmem [shape: bf16[42,40,128], index: 1, kind: input, shape index: {}]   ;;  %s5693_s2 = inlined_call_operand.vmem [shape: f32[42,7,32], index: 2, kind: input, shape index: {}]   ;;  %s5694_s3 = inlined_call_operand.vmem [shape: f32[42,8,32], index: 3, kind: input, shape index: {}]   ;;  %s5695_s4 = inlined_call_operand.vmem [shape: f32[8,128], index: 4, kind: input, shape index: {}]   ;;  %s5696_s5 = inlined_call_operand.hbm [shape: f32[1,8,128], index: 5, kind: output, shape index: {}]  }
   0x1   :  { %11 = vsyncpa [#allocation4], 0  ;;  %s16_s20 = sshll.u32 %s5691_s0, 4  ;;  %s4572_s21 = smov [#allocation2]   ;;  %s17_s20 = int_to_ptr.hbm [resolvable:$true] %s16_s20 }
   0x2   :  { %s18_s22 = sshll.u32 %s4572_s21, 4  ;;  %s4573_s23 = smov 64   ;;  %s19_s22 = int_to_ptr.vmem [resolvable:$true] %s18_s22 }
   0x3   :  { %s4574_s24 = smov 4  }
   0x4   :  { %24 = dma.hbm_to_vmem [thread:$0]  %s17_s20, 2688, %s19_s22, [#allocation3], %s4573_s23, %s4573_s23, %s4574_s24  }
   0x5   :  { %4568 = dma.done.wait [#allocation3], 2688  }
   0x6   :  { %4569 = vsyncadd [#allocation3], 4294964608  ;;  %v84_v0 = vld [vmem:[%s5692_s1 + $0x10] sm:$0xf]  ;;  %v89_v1 = vld [vmem:[%s5692_s1 + $0x24] sm:$0xf] }
   0x7   :  { %v94_v2 = vld [vmem:[%s5692_s1 + $0x38] sm:$0xf]  ;;  %v301_v3 = vunpack.c.l.b16 %v84_v0  ;;  %v330_v4 = vunpack.c.l.b16 %v89_v1  ;;  %v99_v6 = vld [vmem:[%s5692_s1 + $0x4c] sm:$0xf]  ;;  %v4422_v13 = vld [vmem:[%s5692_s1 + $0x1c] sm:$0xff]  ;;  %s4575_s9 = smov 96  }
   0x8   :  { %v359_v5 = vunpack.c.l.b16 %v94_v2  ;;  %v388_v7 = vunpack.c.l.b16 %v99_v6  ;;  %v4420_v12 = vld [vmem:[%s5692_s1 + $0x8] sm:$0xff]  ;;  %v4424_v14 = vld [vmem:[%s5692_s1 + $0x30] sm:$0xff]  ;;  %v104_v16 = vld [vmem:[%s5692_s1 + $0x60] sm:$0xf]  ;;  %vm1594_vm0 = vcmask 261120   ;;  %vm2829_vm1 = vcmask 64512  }
   0x9   :  { %v304_v8 = vpack.c.b16 %v301_v3, %v301_v3  ;;  %v333_v9 = vpack.c.b16 %v330_v4, %v330_v4  ;;  %v4426_v15 = vld [vmem:[%s5692_s1 + $0x44] sm:$0xff]  ;;  %v109_v17 = vld [vmem:[%s5692_s1 + $0x74] sm:$0xf]  ;;  %v119_v19 = vld [vmem:[%s5692_s1 + $0x9c] sm:$0xf]  ;;  %v417_v20 = vunpack.c.l.b16 %v104_v16  ;;  %vm2687_vm2 = vcmask 56320  }
   0xa   :  { %v362_v10 = vpack.c.b16 %v359_v5, %v359_v5  ;;  %v391_v11 = vpack.c.b16 %v388_v7, %v388_v7  ;;  %v114_v18 = vld [vmem:[%s5692_s1 + $0x88] sm:$0xf]  ;;  %v446_v21 = vunpack.c.l.b16 %v109_v17  ;;  %v504_v23 = vunpack.c.l.b16 %v119_v19  ;;  %v4419_v24 = vld [vmem:[%s5692_s1] sm:$0xff]  ;;  %v4421_v25 = vld [vmem:[%s5692_s1 + $0x14] sm:$0xff]  ;;  %s4577_s7 = smov [#allocation5]   ;;  %s3947_s12 = sshll.u32 %s5696_s5, 4  ;;  %s3948_s12 = int_to_ptr.hbm [resolvable:$true] %s3947_s12 }
   0xb   :  { %313 = vmatpush.bf16.xpose.msra.mxu0 %v304_v8  ;;  %342 = vmatpush.bf16.xpose.msra.mxu1 %v333_v9  ;;  %v475_v22 = vunpack.c.l.b16 %v114_v18  ;;  %v4423_v26 = vld [vmem:[%s5692_s1 + $0x28] sm:$0xff]  ;;  %v4425_v27 = vld [vmem:[%s5692_s1 + $0x3c] sm:$0xff]  ;;  %v420_v28 = vpack.c.b16 %v417_v20, %v417_v20  ;;  %v39_v33 = vld [vmem:[#allocation2 + $0x4] sm:$0xf]  ;;  %s3945_s8 = sshll.u32 %s4577_s7, 4  ;;  %vm3938_vm3 = vcmask 64568   ;;  %s3946_s8 = int_to_ptr.vmem [resolvable:$true] %s3945_s8 }
   0xc   :  { %371 = vmatpush.bf16.xpose.msra.mxu2 %v362_v10  ;;  %400 = vmatpush.bf16.xpose.msra.mxu3 %v391_v11  ;;  %v449_v29 = vpack.c.b16 %v446_v21, %v446_v21  ;;  %v507_v31 = vpack.c.b16 %v504_v23, %v504_v23  ;;  %v38_v32 = vld [vmem:[#allocation2] sm:$0xf]  ;;  %v40_v34 = vld [vmem:[#allocation2 + $0x8] sm:$0xf]  ;;  %v41_v35 = vld [vmem:[#allocation2 + $0xc] sm:$0xf] }
   0xd   :  { %v478_v30 = vpack.c.b16 %v475_v22, %v475_v22  ;;  %v4428_v36 = vld [vmem:[%s5692_s1 + $0x58] sm:$0xff]  ;;  %v4430_v37 = vld [vmem:[%s5692_s1 + $0x6c] sm:$0xff]  ;;  %v4432_v38 = vld [vmem:[%s5692_s1 + $0x80] sm:$0xff] }
   0xe   :  { %v4434_v39 = vld [vmem:[%s5692_s1 + $0x94] sm:$0xff]  ;;  %v124_v40 = vld [vmem:[%s5692_s1 + $0xb0] sm:$0xf]  ;;  %v129_v41 = vld [vmem:[%s5692_s1 + $0xc4] sm:$0xf] }
   0xf   :  { %v134_v42 = vld [vmem:[%s5692_s1 + $0xd8] sm:$0xf]  ;;  %v139_v43 = vld [vmem:[%s5692_s1 + $0xec] sm:$0xf]  ;;  %v533_v44 = vunpack.c.l.b16 %v124_v40  ;;  %v562_v45 = vunpack.c.l.b16 %v129_v41  ;;  %v4427_v48 = vld [vmem:[%s5692_s1 + $0x50] sm:$0xff] }
  0x10   :  { %v591_v46 = vunpack.c.l.b16 %v134_v42  ;;  %v620_v47 = vunpack.c.l.b16 %v139_v43  ;;  %v4429_v49 = vld [vmem:[%s5692_s1 + $0x64] sm:$0xff]  ;;  %v4431_v50 = vld [vmem:[%s5692_s1 + $0x78] sm:$0xff]  ;;  %v4433_v51 = vld [vmem:[%s5692_s1 + $0x8c] sm:$0xff] }
  0x11   :  { %v536_v52 = vpack.c.b16 %v533_v44, %v533_v44  ;;  %v565_v53 = vpack.c.b16 %v562_v45, %v562_v45  ;;  %v42_v56 = vld [vmem:[#allocation2 + $0x10] sm:$0xf]  ;;  %v43_v57 = vld [vmem:[#allocation2 + $0x14] sm:$0xf]  ;;  %v44_v58 = vld [vmem:[#allocation2 + $0x18] sm:$0xf] }
  0x12   :  { %v594_v54 = vpack.c.b16 %v591_v46, %v591_v46  ;;  %v623_v55 = vpack.c.b16 %v620_v47, %v620_v47  ;;  %v45_v59 = vld [vmem:[#allocation2 + $0x1c] sm:$0xf]  ;;  %v4436_v60 = vld [vmem:[%s5692_s1 + $0xa8] sm:$0xff]  ;;  %v4440_v62 = vld [vmem:[%s5692_s1 + $0xd0] sm:$0xff] }
  0x13   :  { %314 = vmatpush.bf16.xpose.msra.mxu0 %v4420_v12  ;;  %343 = vmatpush.bf16.xpose.msra.mxu1 %v4422_v13  ;;  %v4438_v61 = vld [vmem:[%s5692_s1 + $0xbc] sm:$0xff]  ;;  %v4442_v63 = vld [vmem:[%s5692_s1 + $0xe4] sm:$0xff]  ;;  %v149_v1 = vld [vmem:[%s5692_s1 + $0x114] sm:$0xf] }
  0x14   :  { %372 = vmatpush.bf16.xpose.msra.mxu2 %v4424_v14  ;;  %401 = vmatpush.bf16.xpose.msra.mxu3 %v4426_v15  ;;  %v144_v0 = vld [vmem:[%s5692_s1 + $0x100] sm:$0xf]  ;;  %v154_v2 = vld [vmem:[%s5692_s1 + $0x128] sm:$0xf]  ;;  %v159_v3 = vld [vmem:[%s5692_s1 + $0x13c] sm:$0xf]  ;;  %v678_v5 = vunpack.c.l.b16 %v149_v1 }
  0x15   :  { %v649_v4 = vunpack.c.l.b16 %v144_v0  ;;  %v707_v6 = vunpack.c.l.b16 %v154_v2  ;;  %v736_v7 = vunpack.c.l.b16 %v159_v3  ;;  %v4435_v8 = vld [vmem:[%s5692_s1 + $0xa0] sm:$0xff]  ;;  %v4437_v9 = vld [vmem:[%s5692_s1 + $0xb4] sm:$0xff]  ;;  %v4439_v10 = vld [vmem:[%s5692_s1 + $0xc8] sm:$0xff] }
  0x16   :  { %v4441_v11 = vld [vmem:[%s5692_s1 + $0xdc] sm:$0xff]  ;;  %v681_v13 = vpack.c.b16 %v678_v5, %v678_v5  ;;  %v47_v17 = vld [vmem:[#allocation2 + $0x24] sm:$0xf]  ;;  %v48_v18 = vld [vmem:[#allocation2 + $0x28] sm:$0xf] }
  0x17   :  { %v652_v12 = vpack.c.b16 %v649_v4, %v649_v4  ;;  %v710_v14 = vpack.c.b16 %v707_v6, %v707_v6  ;;  %v739_v15 = vpack.c.b16 %v736_v7, %v736_v7  ;;  %v46_v16 = vld [vmem:[#allocation2 + $0x20] sm:$0xf]  ;;  %v49_v19 = vld [vmem:[#allocation2 + $0x2c] sm:$0xf]  ;;  %v4444_v20 = vld [vmem:[%s5692_s1 + $0xf8] sm:$0xff] }
  0x18   :  { %v4446_v21 = vld [vmem:[%s5692_s1 + $0x10c] sm:$0xff]  ;;  %v4448_v22 = vld [vmem:[%s5692_s1 + $0x120] sm:$0xff]  ;;  %v4450_v23 = vld [vmem:[%s5692_s1 + $0x134] sm:$0xff] }
  0x19   :  { %v50_v40 = vld [vmem:[#allocation2 + $0x30] sm:$0xf]  ;;  %v51_v41 = vld [vmem:[#allocation2 + $0x34] sm:$0xf]  ;;  %v52_v42 = vld [vmem:[#allocation2 + $0x38] sm:$0xf] }
  0x1a   :  { %v53_v43 = vld [vmem:[#allocation2 + $0x3c] sm:$0xf]  ;;  %v4452_v44 = vld [vmem:[%s5692_s1 + $0x148] sm:$0xff]  ;;  %v4456_v46 = vld [vmem:[%s5692_s1 + $0x170] sm:$0xff] }
  0x1b   :  { %315 = vmatpush.bf16.xpose.msra.mxu0 %v4419_v24  ;;  %344 = vmatpush.bf16.xpose.msra.mxu1 %v4421_v25  ;;  %v164_v24 = vld [vmem:[%s5692_s1 + $0x150] sm:$0xf]  ;;  %v169_v25 = vld [vmem:[%s5692_s1 + $0x164] sm:$0xf]  ;;  %v4454_v45 = vld [vmem:[%s5692_s1 + $0x15c] sm:$0xff] }
  0x1c   :  { %373 = vmatpush.bf16.xpose.msra.mxu2 %v4423_v26  ;;  %402 = vmatpush.bf16.xpose.msra.mxu3 %v4425_v27  ;;  %v174_v26 = vld [vmem:[%s5692_s1 + $0x178] sm:$0xf]  ;;  %v179_v27 = vld [vmem:[%s5692_s1 + $0x18c] sm:$0xf]  ;;  %v4458_v47 = vld [vmem:[%s5692_s1 + $0x184] sm:$0xff] }
  0x1d   :  { %v54_v0 = vld [vmem:[#allocation2 + $0x40] sm:$0xf]  ;;  %v55_v1 = vld [vmem:[#allocation2 + $0x44] sm:$0xf]  ;;  %v56_v2 = vld [vmem:[#allocation2 + $0x48] sm:$0xf] }
  0x1e   :  { %v57_v3 = vld [vmem:[#allocation2 + $0x4c] sm:$0xf]  ;;  %v4460_v4 = vld [vmem:[%s5692_s1 + $0x198] sm:$0xff]  ;;  %v4464_v6 = vld [vmem:[%s5692_s1 + $0x1c0] sm:$0xff] }
  0x1f   :  { %v4462_v5 = vld [vmem:[%s5692_s1 + $0x1ac] sm:$0xff]  ;;  %v4466_v7 = vld [vmem:[%s5692_s1 + $0x1d4] sm:$0xff] }
  0x22   :  { %316 = vmatmul.bf16.vlgmr.msra.gmra.mxu0 %v38_v32  ;;  %345 = vmatmul.bf16.vlgmr.msra.gmra.mxu1 %v39_v33  ;;  %v4443_v32 = vld [vmem:[%s5692_s1 + $0xf0] sm:$0xff]  ;;  %v4445_v33 = vld [vmem:[%s5692_s1 + $0x104] sm:$0xff] }
  0x23   :  { %429 = vmatpush.bf16.xpose.msrb.mxu0 %v420_v28  ;;  %458 = vmatpush.bf16.xpose.msrb.mxu1 %v449_v29  ;;  %v765_v28 = vunpack.c.l.b16 %v164_v24  ;;  %v794_v29 = vunpack.c.l.b16 %v169_v25  ;;  %v58_v24 = vld [vmem:[#allocation2 + $0x50] sm:$0xf]  ;;  %v59_v25 = vld [vmem:[#allocation2 + $0x54] sm:$0xf] }
  0x24   :  { %487 = vmatpush.bf16.xpose.msrb.mxu2 %v478_v30  ;;  %516 = vmatpush.bf16.xpose.msrb.mxu3 %v507_v31  ;;  %v823_v30 = vunpack.c.l.b16 %v174_v26  ;;  %v852_v31 = vunpack.c.l.b16 %v179_v27  ;;  %v60_v26 = vld [vmem:[#allocation2 + $0x58] sm:$0xf]  ;;  %v61_v27 = vld [vmem:[#allocation2 + $0x5c] sm:$0xf] }
  0x25   :  { %374 = vmatmul.bf16.vlgmr.msra.gmra.mxu2 %v40_v34  ;;  %403 = vmatmul.bf16.vlgmr.msra.gmra.mxu3 %v41_v35  ;;  %v4447_v34 = vld [vmem:[%s5692_s1 + $0x118] sm:$0xff]  ;;  %v4449_v35 = vld [vmem:[%s5692_s1 + $0x12c] sm:$0xff] }
  0x2b   :  { %430 = vmatpush.bf16.xpose.msrb.mxu0 %v4428_v36  ;;  %459 = vmatpush.bf16.xpose.msrb.mxu1 %v4430_v37  ;;  %v768_v36 = vpack.c.b16 %v765_v28, %v765_v28  ;;  %v797_v37 = vpack.c.b16 %v794_v29, %v794_v29  ;;  %v4468_v28 = vld [vmem:[%s5692_s1 + $0x1e8] sm:$0xff]  ;;  %v4470_v29 = vld [vmem:[%s5692_s1 + $0x1fc] sm:$0xff] }
  0x2c   :  { %488 = vmatpush.bf16.xpose.msrb.mxu2 %v4432_v38  ;;  %517 = vmatpush.bf16.xpose.msrb.mxu3 %v4434_v39  ;;  %v826_v38 = vpack.c.b16 %v823_v30, %v823_v30  ;;  %v855_v39 = vpack.c.b16 %v852_v31, %v852_v31  ;;  %v4472_v30 = vld [vmem:[%s5692_s1 + $0x210] sm:$0xff]  ;;  %v4474_v31 = vld [vmem:[%s5692_s1 + $0x224] sm:$0xff] }
  0x33   :  { %431 = vmatpush.bf16.xpose.msrb.mxu0 %v4427_v48  ;;  %460 = vmatpush.bf16.xpose.msrb.mxu1 %v4429_v49  ;;  %v184_v48 = vld [vmem:[%s5692_s1 + $0x1a0] sm:$0xf]  ;;  %v189_v49 = vld [vmem:[%s5692_s1 + $0x1b4] sm:$0xf] }
  0x34   :  { %489 = vmatpush.bf16.xpose.msrb.mxu2 %v4431_v50  ;;  %518 = vmatpush.bf16.xpose.msrb.mxu3 %v4433_v51  ;;  %v194_v50 = vld [vmem:[%s5692_s1 + $0x1c8] sm:$0xf]  ;;  %v199_v51 = vld [vmem:[%s5692_s1 + $0x1dc] sm:$0xf] }
  0x3a   :  { %432 = vmatmul.bf16.vlgmr.msrb.gmra.mxu0 %v42_v56  ;;  %461 = vmatmul.bf16.vlgmr.msrb.gmra.mxu1 %v43_v57  ;;  %v4451_v56 = vld [vmem:[%s5692_s1 + $0x140] sm:$0xff]  ;;  %v4453_v57 = vld [vmem:[%s5692_s1 + $0x154] sm:$0xff] }
  0x3b   :  { %545 = vmatpush.bf16.xpose.msra.mxu0 %v536_v52  ;;  %574 = vmatpush.bf16.xpose.msra.mxu1 %v565_v53  ;;  %v881_v52 = vunpack.c.l.b16 %v184_v48  ;;  %v910_v53 = vunpack.c.l.b16 %v189_v49  ;;  %v62_v48 = vld [vmem:[#allocation2 + $0x60] sm:$0xf]  ;;  %v63_v49 = vld [vmem:[#allocation2 + $0x64] sm:$0xf] }
  0x3c   :  { %603 = vmatpush.bf16.xpose.msra.mxu2 %v594_v54  ;;  %632 = vmatpush.bf16.xpose.msra.mxu3 %v623_v55  ;;  %v939_v54 = vunpack.c.l.b16 %v194_v50  ;;  %v968_v55 = vunpack.c.l.b16 %v199_v51  ;;  %v64_v50 = vld [vmem:[#allocation2 + $0x68] sm:$0xf]  ;;  %v65_v51 = vld [vmem:[#allocation2 + $0x6c] sm:$0xf] }
  0x3d   :  { %490 = vmatmul.bf16.vlgmr.msrb.gmra.mxu2 %v44_v58  ;;  %519 = vmatmul.bf16.vlgmr.msrb.gmra.mxu3 %v45_v59  ;;  %v4455_v58 = vld [vmem:[%s5692_s1 + $0x168] sm:$0xff]  ;;  %v4457_v59 = vld [vmem:[%s5692_s1 + $0x17c] sm:$0xff] }
  0x43   :  { %546 = vmatpush.bf16.xpose.msra.mxu0 %v4436_v60  ;;  %575 = vmatpush.bf16.xpose.msra.mxu1 %v4438_v61  ;;  %v884_v60 = vpack.c.b16 %v881_v52, %v881_v52  ;;  %v913_v61 = vpack.c.b16 %v910_v53, %v910_v53  ;;  %v4476_v52 = vld [vmem:[%s5692_s1 + $0x238] sm:$0xff]  ;;  %v4478_v53 = vld [vmem:[%s5692_s1 + $0x24c] sm:$0xff] }
  0x44   :  { %604 = vmatpush.bf16.xpose.msra.mxu2 %v4440_v62  ;;  %633 = vmatpush.bf16.xpose.msra.mxu3 %v4442_v63  ;;  %v942_v62 = vpack.c.b16 %v939_v54, %v939_v54  ;;  %v971_v63 = vpack.c.b16 %v968_v55, %v968_v55  ;;  %v4480_v54 = vld [vmem:[%s5692_s1 + $0x260] sm:$0xff]  ;;  %v4482_v55 = vld [vmem:[%s5692_s1 + $0x274] sm:$0xff] }
  0x4b   :  { %547 = vmatpush.bf16.xpose.msra.mxu0 %v4435_v8  ;;  %576 = vmatpush.bf16.xpose.msra.mxu1 %v4437_v9  ;;  %v204_v8 = vld [vmem:[%s5692_s1 + $0x1f0] sm:$0xf]  ;;  %v209_v9 = vld [vmem:[%s5692_s1 + $0x204] sm:$0xf] }
  0x4c   :  { %605 = vmatpush.bf16.xpose.msra.mxu2 %v4439_v10  ;;  %634 = vmatpush.bf16.xpose.msra.mxu3 %v4441_v11  ;;  %v214_v10 = vld [vmem:[%s5692_s1 + $0x218] sm:$0xf]  ;;  %v219_v11 = vld [vmem:[%s5692_s1 + $0x22c] sm:$0xf] }
  0x52   :  { %548 = vmatmul.bf16.vlgmr.msra.gmra.mxu0 %v46_v16  ;;  %577 = vmatmul.bf16.vlgmr.msra.gmra.mxu1 %v47_v17  ;;  %v4459_v16 = vld [vmem:[%s5692_s1 + $0x190] sm:$0xff]  ;;  %v4461_v17 = vld [vmem:[%s5692_s1 + $0x1a4] sm:$0xff] }
  0x53   :  { %661 = vmatpush.bf16.xpose.msrb.mxu0 %v652_v12  ;;  %690 = vmatpush.bf16.xpose.msrb.mxu1 %v681_v13  ;;  %v997_v12 = vunpack.c.l.b16 %v204_v8  ;;  %v1026_v13 = vunpack.c.l.b16 %v209_v9  ;;  %v4914_v8 = vld [vmem:[%s5695_s4] ss:$0 sm:$0xff]  ;;  %v66_v9 = vld [vmem:[#allocation2 + $0x70] sm:$0xf] }
  0x54   :  { %719 = vmatpush.bf16.xpose.msrb.mxu2 %v710_v14  ;;  %748 = vmatpush.bf16.xpose.msrb.mxu3 %v739_v15  ;;  %v1055_v14 = vunpack.c.l.b16 %v214_v10  ;;  %v1084_v15 = vunpack.c.l.b16 %v219_v11  ;;  %v67_v10 = vld [vmem:[#allocation2 + $0x74] sm:$0xf]  ;;  %v68_v11 = vld [vmem:[#allocation2 + $0x78] sm:$0xf] }
  0x55   :  { %606 = vmatmul.bf16.vlgmr.msra.gmra.mxu2 %v48_v18  ;;  %635 = vmatmul.bf16.vlgmr.msra.gmra.mxu3 %v49_v19  ;;  %v4463_v18 = vld [vmem:[%s5692_s1 + $0x1b8] sm:$0xff]  ;;  %v4465_v19 = vld [vmem:[%s5692_s1 + $0x1cc] sm:$0xff] }
  0x5b   :  { %662 = vmatpush.bf16.xpose.msrb.mxu0 %v4444_v20  ;;  %691 = vmatpush.bf16.xpose.msrb.mxu1 %v4446_v21  ;;  %v1000_v20 = vpack.c.b16 %v997_v12, %v997_v12  ;;  %v1029_v21 = vpack.c.b16 %v1026_v13, %v1026_v13  ;;  %v69_v12 = vld [vmem:[#allocation2 + $0x7c] sm:$0xf]  ;;  %v4484_v13 = vld [vmem:[%s5692_s1 + $0x288] sm:$0xff] }
  0x5c   :  { %720 = vmatpush.bf16.xpose.msrb.mxu2 %v4448_v22  ;;  %749 = vmatpush.bf16.xpose.msrb.mxu3 %v4450_v23  ;;  %v1058_v22 = vpack.c.b16 %v1055_v14, %v1055_v14  ;;  %v1087_v23 = vpack.c.b16 %v1084_v15, %v1084_v15  ;;  %v4486_v14 = vld [vmem:[%s5692_s1 + $0x29c] sm:$0xff] }
  0x63   :  { %663 = vmatpush.bf16.xpose.msrb.mxu0 %v4443_v32  ;;  %692 = vmatpush.bf16.xpose.msrb.mxu1 %v4445_v33  ;;  %v224_v32 = vld [vmem:[%s5692_s1 + $0x240] sm:$0xf]  ;;  %v229_v33 = vld [vmem:[%s5692_s1 + $0x254] sm:$0xf] }
  0x64   :  { %721 = vmatpush.bf16.xpose.msrb.mxu2 %v4447_v34  ;;  %750 = vmatpush.bf16.xpose.msrb.mxu3 %v4449_v35  ;;  %v234_v34 = vld [vmem:[%s5692_s1 + $0x268] sm:$0xf]  ;;  %v239_v35 = vld [vmem:[%s5692_s1 + $0x27c] sm:$0xf] }
  0x6a   :  { %664 = vmatmul.bf16.vlgmr.msrb.gmra.mxu0 %v50_v40  ;;  %693 = vmatmul.bf16.vlgmr.msrb.gmra.mxu1 %v51_v41  ;;  %v4467_v40 = vld [vmem:[%s5692_s1 + $0x1e0] sm:$0xff]  ;;  %v4469_v41 = vld [vmem:[%s5692_s1 + $0x1f4] sm:$0xff] }
  0x6b   :  { %777 = vmatpush.bf16.xpose.msra.mxu0 %v768_v36  ;;  %806 = vmatpush.bf16.xpose.msra.mxu1 %v797_v37  ;;  %v1113_v36 = vunpack.c.l.b16 %v224_v32  ;;  %v1142_v37 = vunpack.c.l.b16 %v229_v33  ;;  %v4483_v33 = vld [vmem:[%s5692_s1 + $0x280] sm:$0xff] }
  0x6c   :  { %835 = vmatpush.bf16.xpose.msra.mxu2 %v826_v38  ;;  %864 = vmatpush.bf16.xpose.msra.mxu3 %v855_v39  ;;  %v1171_v38 = vunpack.c.l.b16 %v234_v34  ;;  %v1200_v39 = vunpack.c.l.b16 %v239_v35  ;;  %v4485_v34 = vld [vmem:[%s5692_s1 + $0x294] sm:$0xff] }
  0x6d   :  { %722 = vmatmul.bf16.vlgmr.msrb.gmra.mxu2 %v52_v42  ;;  %751 = vmatmul.bf16.vlgmr.msrb.gmra.mxu3 %v53_v43  ;;  %v4471_v42 = vld [vmem:[%s5692_s1 + $0x208] sm:$0xff]  ;;  %v4473_v43 = vld [vmem:[%s5692_s1 + $0x21c] sm:$0xff] }
  0x73   :  { %778 = vmatpush.bf16.xpose.msra.mxu0 %v4452_v44  ;;  %807 = vmatpush.bf16.xpose.msra.mxu1 %v4454_v45  ;;  %v1116_v44 = vpack.c.b16 %v1113_v36, %v1113_v36  ;;  %v1145_v45 = vpack.c.b16 %v1142_v37, %v1142_v37 }
  0x74   :  { %836 = vmatpush.bf16.xpose.msra.mxu2 %v4456_v46  ;;  %865 = vmatpush.bf16.xpose.msra.mxu3 %v4458_v47  ;;  %v1174_v46 = vpack.c.b16 %v1171_v38, %v1171_v38  ;;  %v1203_v47 = vpack.c.b16 %v1200_v39, %v1200_v39  ;;  %v4487_v39 = vld [vmem:[%s5692_s1 + $0x2a8] sm:$0xff] }
  0x7b   :  { %779 = vmatpush.bf16.xpose.msra.mxu0 %v4451_v56  ;;  %808 = vmatpush.bf16.xpose.msra.mxu1 %v4453_v57  ;;  %v244_v56 = vld [vmem:[%s5692_s1 + $0x290] sm:$0xf]  ;;  %v249_v57 = vld [vmem:[%s5692_s1 + $0x2a4] sm:$0xf] }
  0x7c   :  { %837 = vmatpush.bf16.xpose.msra.mxu2 %v4455_v58  ;;  %866 = vmatpush.bf16.xpose.msra.mxu3 %v4457_v59  ;;  %v254_v58 = vld [vmem:[%s5692_s1 + $0x2b8] sm:$0xf]  ;;  %v259_v59 = vld [vmem:[%s5692_s1 + $0x2cc] sm:$0xf] }
  0x82   :  { %780 = vmatmul.bf16.vlgmr.msra.gmra.mxu0 %v54_v0  ;;  %809 = vmatmul.bf16.vlgmr.msra.gmra.mxu1 %v55_v1  ;;  %v4475_v0 = vld [vmem:[%s5692_s1 + $0x230] sm:$0xff]  ;;  %v4477_v1 = vld [vmem:[%s5692_s1 + $0x244] sm:$0xff] }
  0x83   :  { %893 = vmatpush.bf16.xpose.msrb.mxu0 %v884_v60  ;;  %922 = vmatpush.bf16.xpose.msrb.mxu1 %v913_v61  ;;  %v1229_v60 = vunpack.c.l.b16 %v244_v56  ;;  %v1258_v61 = vunpack.c.l.b16 %v249_v57  ;;  %v4496_v57 = vld [vmem:[%s5692_s1 + $0x300] sm:$0xff] }
  0x84   :  { %951 = vmatpush.bf16.xpose.msrb.mxu2 %v942_v62  ;;  %980 = vmatpush.bf16.xpose.msrb.mxu3 %v971_v63  ;;  %v1287_v62 = vunpack.c.l.b16 %v254_v58  ;;  %v1316_v63 = vunpack.c.l.b16 %v259_v59  ;;  %v4498_v58 = vld [vmem:[%s5692_s1 + $0x314] sm:$0xff] }
  0x85   :  { %838 = vmatmul.bf16.vlgmr.msra.gmra.mxu2 %v56_v2  ;;  %867 = vmatmul.bf16.vlgmr.msra.gmra.mxu3 %v57_v3  ;;  %v4479_v2 = vld [vmem:[%s5692_s1 + $0x258] sm:$0xff]  ;;  %v4481_v3 = vld [vmem:[%s5692_s1 + $0x26c] sm:$0xff] }
  0x8b   :  { %894 = vmatpush.bf16.xpose.msrb.mxu0 %v4460_v4  ;;  %923 = vmatpush.bf16.xpose.msrb.mxu1 %v4462_v5  ;;  %v1232_v4 = vpack.c.b16 %v1229_v60, %v1229_v60  ;;  %v1261_v5 = vpack.c.b16 %v1258_v61, %v1258_v61  ;;  %v284_v61 = vld [vmem:[%s5692_s1 + $0x330] sm:$0xf] }
  0x8c   :  { %952 = vmatpush.bf16.xpose.msrb.mxu2 %v4464_v6  ;;  %981 = vmatpush.bf16.xpose.msrb.mxu3 %v4466_v7  ;;  %v1290_v6 = vpack.c.b16 %v1287_v62, %v1287_v62  ;;  %v1319_v7 = vpack.c.b16 %v1316_v63, %v1316_v63  ;;  %v289_v62 = vld [vmem:[%s5692_s1 + $0x344] sm:$0xf] }
  0x93   :  { %895 = vmatpush.bf16.xpose.msrb.mxu0 %v4459_v16  ;;  %924 = vmatpush.bf16.xpose.msrb.mxu1 %v4461_v17  ;;  %v4488_v17 = vld [vmem:[%s5692_s1 + $0x2b0] sm:$0xff] }
  0x94   :  { %953 = vmatpush.bf16.xpose.msrb.mxu2 %v4463_v18  ;;  %982 = vmatpush.bf16.xpose.msrb.mxu3 %v4465_v19  ;;  %v4490_v18 = vld [vmem:[%s5692_s1 + $0x2c4] sm:$0xff] }
  0x9a   :  { %896 = vmatmul.bf16.vlgmr.msrb.gmra.mxu0 %v58_v24  ;;  %925 = vmatmul.bf16.vlgmr.msrb.gmra.mxu1 %v59_v25  ;;  %v274_v25 = vld [vmem:[%s5692_s1 + $0x308] sm:$0xf] }
  0x9b   :  { %1009 = vmatpush.bf16.xpose.msra.mxu0 %v1000_v20  ;;  %1038 = vmatpush.bf16.xpose.msra.mxu1 %v1029_v21  ;;  %v264_v21 = vld [vmem:[%s5692_s1 + $0x2e0] sm:$0xf] }
  0x9c   :  { %1067 = vmatpush.bf16.xpose.msra.mxu2 %v1058_v22  ;;  %1096 = vmatpush.bf16.xpose.msra.mxu3 %v1087_v23  ;;  %v269_v22 = vld [vmem:[%s5692_s1 + $0x2f4] sm:$0xf] }
  0x9d   :  { %954 = vmatmul.bf16.vlgmr.msrb.gmra.mxu2 %v60_v26  ;;  %983 = vmatmul.bf16.vlgmr.msrb.gmra.mxu3 %v61_v27  ;;  %v279_v26 = vld [vmem:[%s5692_s1 + $0x31c] sm:$0xf]  ;;  %v1345_v27 = vunpack.c.l.b16 %v264_v21  ;;  %v1553_v21 = vld [vmem:[%s5693_s2 + $0x8] sm:$0x7f] }
  0x9f   :  { %v317_v15 = vpop.f32.mrf.mxu0  ;;  %v346_v16 = vpop.f32.mrf.mxu1 }
  0xa0   :  { %v4929_v19 = vadd.f32 %v4914_v8, %v317_v15  ;;  %v4932_v20 = vadd.f32 %v4914_v8, %v346_v16 }
  0xa2   :  { %v1510_v23 = vmax.f32 %v4929_v19, 0.0  ;;  %v1511_v24 = vmax.f32 %v4932_v20, 0.0 }
  0xa3   :  { %1010 = vmatpush.bf16.xpose.msra.mxu0 %v4468_v28  ;;  %1039 = vmatpush.bf16.xpose.msra.mxu1 %v4470_v29  ;;  %v1374_v28 = vunpack.c.l.b16 %v269_v22  ;;  %v1403_v29 = vunpack.c.l.b16 %v274_v25 }
  0xa4   :  { %1068 = vmatpush.bf16.xpose.msra.mxu2 %v4472_v30  ;;  %1097 = vmatpush.bf16.xpose.msra.mxu3 %v4474_v31  ;;  %v1432_v30 = vunpack.c.l.b16 %v279_v26  ;;  %v74_v26 = vld [vmem:[#allocation2 + $0x90] sm:$0xf] }
  0xa5   :  { %2827 = vrot.lane.b32.xlu0 %v1510_v23, %s4575_s9  ;;  %2852 = vrot.lane.b32.xlu1 %v1511_v24, %s4575_s9 }
  0xa7   :  { %v319_v36 = vpop.f32.mrf.mxu0  ;;  %v348_v38 = vpop.f32.mrf.mxu1 }
  0xa8   :  { %v375_v31 = vpop.f32.mrf.mxu2  ;;  %v404_v32 = vpop.f32.mrf.mxu3  ;;  %v1555_v36 = vld [vmem:[%s5693_s2 + $0x18] sm:$0x7f] }
  0xa9   :  { %v4961_v35 = vadd.f32 %v4914_v8, %v375_v31  ;;  %v4964_v37 = vadd.f32 %v4914_v8, %v404_v32  ;;  %v4502_v31 = vld [vmem:[%s5692_s1 + $0x33c] sm:$0xff] }
  0xab   :  { %1011 = vmatpush.bf16.xpose.msra.mxu0 %v4467_v40  ;;  %1040 = vmatpush.bf16.xpose.msra.mxu1 %v4469_v41  ;;  %v4489_v40 = vld [vmem:[%s5692_s1 + $0x2bc] sm:$0xff]  ;;  %v1348_v41 = vpack.c.b16 %v1345_v27, %v1345_v27  ;;  %v75_v27 = vld [vmem:[#allocation2 + $0x94] sm:$0xf] }
  0xac   :  { %1069 = vmatpush.bf16.xpose.msra.mxu2 %v4471_v42  ;;  %1098 = vmatpush.bf16.xpose.msra.mxu3 %v4473_v43  ;;  %v1377_v42 = vpack.c.b16 %v1374_v28, %v1374_v28  ;;  %v1406_v43 = vpack.c.b16 %v1403_v29, %v1403_v29  ;;  %v76_v28 = vld [vmem:[#allocation2 + $0x98] sm:$0xf]  ;;  %v77_v29 = vld [vmem:[#allocation2 + $0x9c] sm:$0xf] }
  0xb2   :  { %1012 = vmatmul.bf16.vlgmr.msra.gmra.mxu0 %v62_v48  ;;  %1041 = vmatmul.bf16.vlgmr.msra.gmra.mxu1 %v63_v49  ;;  %v406_v48 = vpop.f32.mrf.mxu3  ;;  %v70_v49 = vld [vmem:[#allocation2 + $0x80] sm:$0xf] }
  0xb3   :  { %1125 = vmatpush.bf16.xpose.msrb.mxu0 %v1116_v44  ;;  %1154 = vmatpush.bf16.xpose.msrb.mxu1 %v1145_v45  ;;  %v1435_v44 = vpack.c.b16 %v1432_v30, %v1432_v30  ;;  %v1512_v45 = vmax.f32 %v4961_v35, 0.0  ;;  %v4500_v30 = vld [vmem:[%s5692_s1 + $0x328] sm:$0xff] }
  0xb4   :  { %1183 = vmatpush.bf16.xpose.msrb.mxu2 %v1174_v46  ;;  %1212 = vmatpush.bf16.xpose.msrb.mxu3 %v1203_v47  ;;  %v1513_v46 = vmax.f32 %v4964_v37, 0.0  ;;  %v377_v47 = vpop.f32.mrf.mxu2 }
  0xb5   :  { %1070 = vmatmul.bf16.vlgmr.msra.gmra.mxu2 %v64_v50  ;;  %1099 = vmatmul.bf16.vlgmr.msra.gmra.mxu3 %v65_v51  ;;  %v71_v50 = vld [vmem:[#allocation2 + $0x84] sm:$0xf]  ;;  %v72_v51 = vld [vmem:[#allocation2 + $0x88] sm:$0xf]  ;;  %v4501_v47 = vld [vmem:[%s5692_s1 + $0x334] sm:$0xff] }
  0xb6   :  { %2876 = vrot.lane.b32.xlu0 %v1512_v45, %s4575_s9  ;;  %2900 = vrot.lane.b32.xlu1 %v1513_v46, %s4575_s9 }
  0xb7   :  { %v462_v56 = vpop.f32.mrf.mxu1 }
  0xb8   :  { %v4996_v60 = vadd.f32 %v4914_v8, %v462_v56 }
  0xba   :  { %v1515_v63 = vmax.f32 %v4996_v60, 0.0 }
  0xbb   :  { %1126 = vmatpush.bf16.xpose.msrb.mxu0 %v4476_v52  ;;  %1155 = vmatpush.bf16.xpose.msrb.mxu1 %v4478_v53  ;;  %v73_v52 = vld [vmem:[#allocation2 + $0x8c] sm:$0xf]  ;;  %v4492_v53 = vld [vmem:[%s5692_s1 + $0x2d8] sm:$0xff] }
  0xbc   :  { %1184 = vmatpush.bf16.xpose.msrb.mxu2 %v4480_v54  ;;  %1213 = vmatpush.bf16.xpose.msrb.mxu3 %v4482_v55  ;;  %v4494_v54 = vld [vmem:[%s5692_s1 + $0x2ec] sm:$0xff]  ;;  %v433_v55 = vpop.f32.mrf.mxu0 }
  0xbd   :  { %v4993_v59 = vadd.f32 %v4914_v8, %v433_v55  ;;  %v1558_v55 = vld [vmem:[%s5693_s2 + $0x30] sm:$0x7f] }
  0xbe   :  { %2948 = vrot.lane.b32.xlu1 %v1515_v63, %s4575_s9 }
  0xc3   :  { %1127 = vmatpush.bf16.xpose.msrb.mxu0 %v4475_v0  ;;  %1156 = vmatpush.bf16.xpose.msrb.mxu1 %v4477_v1  ;;  %v1514_v0 = vmax.f32 %v4993_v59, 0.0  ;;  %v1461_v1 = vunpack.c.l.b16 %v284_v61  ;;  %v79_v61 = vld [vmem:[#allocation2 + $0xa4] sm:$0xf] }
  0xc4   :  { %1185 = vmatpush.bf16.xpose.msrb.mxu2 %v4479_v2  ;;  %1214 = vmatpush.bf16.xpose.msrb.mxu3 %v4481_v3  ;;  %v1490_v2 = vunpack.c.l.b16 %v289_v62  ;;  %v491_v3 = vpop.f32.mrf.mxu2  ;;  %v1556_v62 = vld [vmem:[%s5693_s2 + $0x20] sm:$0x7f] }
  0xc5   :  { %2924 = vrot.lane.b32.xlu2 %v1514_v0, %s4575_s9 }
  0xc6   :  { %v1493_v15 = vpack.c.b16 %v1490_v2, %v1490_v2 }
  0xca   :  { %1128 = vmatmul.bf16.vlgmr.msrb.gmra.mxu0 %v66_v9  ;;  %1157 = vmatmul.bf16.vlgmr.msrb.gmra.mxu1 %v67_v10  ;;  %v435_v9 = vpop.f32.mrf.mxu0 }
  0xcb   :  { %1241 = vmatpush.bf16.xpose.msra.mxu0 %v1232_v4  ;;  %1270 = vmatpush.bf16.xpose.msra.mxu1 %v1261_v5  ;;  %v520_v4 = vpop.f32.mrf.mxu3  ;;  %v4491_v5 = vld [vmem:[%s5692_s1 + $0x2d0] sm:$0xff]  ;;  %v1561_v9 = vld [vmem:[%s5693_s2 + $0x48] sm:$0x7f] }
  0xcc   :  { %1299 = vmatpush.bf16.xpose.msra.mxu2 %v1290_v6  ;;  %1328 = vmatpush.bf16.xpose.msra.mxu3 %v1319_v7  ;;  %v4493_v6 = vld [vmem:[%s5692_s1 + $0x2e4] sm:$0xff]  ;;  %v5019_v7 = vadd.f32 %v4914_v8, %v491_v3  ;;  %v5022_v10 = vadd.f32 %v4914_v8, %v520_v4  ;;  %v493_v22 = vpop.f32.mrf.mxu2  ;;  %v1562_v4 = vld [vmem:[%s5693_s2 + $0x50] sm:$0x7f] }
  0xcd   :  { %1186 = vmatmul.bf16.vlgmr.msrb.gmra.mxu2 %v68_v11  ;;  %1215 = vmatmul.bf16.vlgmr.msrb.gmra.mxu3 %v69_v12  ;;  %v464_v11 = vpop.f32.mrf.mxu1  ;;  %v4495_v12 = vld [vmem:[%s5692_s1 + $0x2f8] sm:$0xff] }
  0xce   :  { %v1516_v16 = vmax.f32 %v5019_v7, 0.0 }
  0xd0   :  { %2972 = vrot.lane.b32.xlu2 %v1516_v16, %s4575_s9 }
  0xd2   :  { %v549_v32 = vpop.f32.mrf.mxu0 }
  0xd3   :  { %1242 = vmatpush.bf16.xpose.msra.mxu0 %v4484_v13  ;;  %1271 = vmatpush.bf16.xpose.msra.mxu1 %v4486_v14  ;;  %v4497_v13 = vld [vmem:[%s5692_s1 + $0x30c] sm:$0xff]  ;;  %v1464_v14 = vpack.c.b16 %v1461_v1, %v1461_v1  ;;  %v522_v25 = vpop.f32.mrf.mxu3  ;;  %v5059_v38 = vadd.f32 %v4914_v8, %v549_v32 }
  0xd4   :  { %1300 = vmatpush.bf16.xpose.msra.mxu2 %v4488_v17  ;;  %1329 = vmatpush.bf16.xpose.msra.mxu3 %v4490_v18  ;;  %v1517_v17 = vmax.f32 %v5022_v10, 0.0  ;;  %v1552_v18 = vld [vmem:[%s5693_s2] sm:$0x7f]  ;;  %v1557_v1 = vld [vmem:[%s5693_s2 + $0x28] sm:$0x7f] }
  0xd5   :  { %v1566_v25 = vld [vmem:[%s5693_s2 + $0x70] sm:$0x7f]  ;;  %v1568_v10 = vld [vmem:[%s5693_s2 + $0x80] sm:$0x7f] }
  0xd6   :  { %2996 = vrot.lane.b32.xlu0 %v1517_v17, %s4575_s9 }
  0xdb   :  { %1243 = vmatpush.bf16.xpose.msra.mxu0 %v4483_v33  ;;  %1272 = vmatpush.bf16.xpose.msra.mxu1 %v4485_v34  ;;  %v578_v33 = vpop.f32.mrf.mxu1  ;;  %v1554_v34 = vld [vmem:[%s5693_s2 + $0x10] sm:$0x7f] }
  0xdc   :  { %1301 = vmatpush.bf16.xpose.msra.mxu2 %v4487_v39  ;;  %1330 = vmatpush.bf16.xpose.msra.mxu3 %v4489_v40  ;;  %v5062_v39 = vadd.f32 %v4914_v8, %v578_v33  ;;  %v1518_v40 = vmax.f32 %v5059_v38, 0.0 }
  0xde   :  { %3020 = vrot.lane.b32.xlu0 %v1518_v40, %s4575_s9 }
  0xe2   :  { %1244 = vmatmul.bf16.vlgmr.msra.gmra.mxu0 %v70_v49  ;;  %1273 = vmatmul.bf16.vlgmr.msra.gmra.mxu1 %v71_v50  ;;  %v551_v49 = vpop.f32.mrf.mxu0 }
  0xe3   :  { %1357 = vmatpush.bf16.xpose.msrb.mxu0 %v1348_v41  ;;  %1386 = vmatpush.bf16.xpose.msrb.mxu1 %v1377_v42  ;;  %v1519_v41 = vmax.f32 %v5062_v39, 0.0  ;;  %v607_v42 = vpop.f32.mrf.mxu2  ;;  %v1572_v39 = vld [vmem:[%s5693_s2 + $0xa0] sm:$0x7f] }
  0xe4   :  { %1415 = vmatpush.bf16.xpose.msrb.mxu2 %v1406_v43  ;;  %1444 = vmatpush.bf16.xpose.msrb.mxu3 %v1435_v44  ;;  %v636_v43 = vpop.f32.mrf.mxu3  ;;  %v4499_v44 = vld [vmem:[%s5692_s1 + $0x320] sm:$0xff]  ;;  %v5081_v48 = vadd.f32 %v4914_v8, %v607_v42  ;;  %v1575_v42 = vld [vmem:[%s5693_s2 + $0xb8] sm:$0x7f]  ;;  %s4576_s1 = smov 7  }
  0xe5   :  { %1302 = vmatmul.bf16.vlgmr.msra.gmra.mxu2 %v72_v51  ;;  %1331 = vmatmul.bf16.vlgmr.msra.gmra.mxu3 %v73_v52  ;;  %v5084_v50 = vadd.f32 %v4914_v8, %v636_v43  ;;  %v580_v51 = vpop.f32.mrf.mxu1 }
  0xe6   :  { %3044 = vrot.lane.b32.xlu2 %v1519_v41, %s4575_s9  ;;  %v1520_v52 = vmax.f32 %v5081_v48, 0.0 }
  0xea   :  { %v665_v2 = vpop.f32.mrf.mxu0 }
  0xeb   :  { %1358 = vmatpush.bf16.xpose.msrb.mxu0 %v4492_v53  ;;  %1387 = vmatpush.bf16.xpose.msrb.mxu1 %v4494_v54  ;;  %v1521_v53 = vmax.f32 %v5084_v50, 0.0  ;;  %v1559_v54 = vld [vmem:[%s5693_s2 + $0x38] sm:$0x7f]  ;;  %v609_v56 = vpop.f32.mrf.mxu2  ;;  %v5121_v20 = vadd.f32 %v4914_v8, %v665_v2 }
  0xec   :  { %1416 = vmatpush.bf16.xpose.msrb.mxu2 %v4496_v57  ;;  %1445 = vmatpush.bf16.xpose.msrb.mxu3 %v4498_v58  ;;  %v638_v57 = vpop.f32.mrf.mxu3  ;;  %v78_v58 = vld [vmem:[#allocation2 + $0xa0] sm:$0xf]  ;;  %v1579_v56 = vld [vmem:[%s5693_s2 + $0xd8] sm:$0x7f] }
  0xed   :  { %3092 = vrot.lane.b32.xlu1 %v1521_v53, %s4575_s9  ;;  %v694_v3 = vpop.f32.mrf.mxu1  ;;  %v1522_v19 = vmax.f32 %v5121_v20, 0.0  ;;  %v1581_v20 = vld [vmem:[%s5693_s2 + $0xe8] sm:$0x7f] }
  0xee   :  { %3068 = vrot.lane.b32.xlu2 %v1520_v52, %s4575_s9 }
  0xf3   :  { %1359 = vmatpush.bf16.xpose.msrb.mxu0 %v4491_v5  ;;  %1388 = vmatpush.bf16.xpose.msrb.mxu1 %v4493_v6  ;;  %v1563_v5 = vld [vmem:[%s5693_s2 + $0x58] sm:$0x7f]  ;;  %v1560_v6 = vld [vmem:[%s5693_s2 + $0x40] sm:$0x7f]  ;;  %v723_v11 = vpop.f32.mrf.mxu2 }
  0xf4   :  { %1417 = vmatpush.bf16.xpose.msrb.mxu2 %v4495_v12  ;;  %1446 = vmatpush.bf16.xpose.msrb.mxu3 %v4497_v13  ;;  %v752_v12 = vpop.f32.mrf.mxu3  ;;  %v724_v13 = vadd.f32 %v4914_v8, %v723_v11 }
  0xf5   :  { %3116 = vrot.lane.b32.xlu1 %v1522_v19, %s4575_s9 }
  0xfa   :  { %1360 = vmatmul.bf16.vlgmr.msrb.gmra.mxu0 %v74_v26  ;;  %1389 = vmatmul.bf16.vlgmr.msrb.gmra.mxu1 %v75_v27  ;;  %v1567_v26 = vld [vmem:[%s5693_s2 + $0x78] sm:$0x7f]  ;;  %v1569_v27 = vld [vmem:[%s5693_s2 + $0x88] sm:$0x7f] }
  0xfb   :  { %1473 = vmatpush.bf16.xpose.msra.mxu0 %v1464_v14  ;;  %1502 = vmatpush.bf16.xpose.msra.mxu1 %v1493_v15  ;;  %v667_v14 = vpop.f32.mrf.mxu0  ;;  %v753_v15 = vadd.f32 %v4914_v8, %v752_v12  ;;  %v725_v37 = vpop.f32.mrf.mxu2 }
  0xfc   :  { %4293 = vmatpush.xpose.msk.msra.mxu2 %vm1594_vm0, %v1552_v18  ;;  %4295 = vmatpush.xpose.msk.msra.mxu3 %vm1594_vm0, %v1553_v21  ;;  %v696_v18 = vpop.f32.mrf.mxu1  ;;  %v1524_v21 = vmax.f32 %v724_v13, 0.0  ;;  %v754_v35 = vpop.f32.mrf.mxu3  ;;  %v1583_v13 = vld [vmem:[%s5693_s2 + $0xf8] sm:$0x7f]  ;;  %v1585_v37 = vld [vmem:[%s5693_s2 + $0x108] sm:$0x7f] }
  0xfd   :  { %1418 = vmatmul.bf16.vlgmr.msrb.gmra.mxu2 %v76_v28  ;;  %1447 = vmatmul.bf16.vlgmr.msrb.gmra.mxu3 %v77_v29  ;;  %v1525_v22 = vmax.f32 %v753_v15, 0.0  ;;  %v1571_v28 = vld [vmem:[%s5693_s2 + $0x98] sm:$0x7f] }
  0xff   :  { %3188 = vrot.lane.b32.xlu2 %v1525_v22, %s4575_s9 }
 0x100   :  { %4297 = vmatpush.xpose.msk.msrb.mxu2 %vm1594_vm0, %v1554_v34  ;;  %4299 = vmatpush.xpose.msk.msrb.mxu3 %vm1594_vm0, %v1555_v36 }
 0x103   :  { %1474 = vmatpush.bf16.xpose.msra.mxu0 %v4500_v30  ;;  %1503 = vmatpush.bf16.xpose.msra.mxu1 %v4502_v31  ;;  %v781_v60 = vpop.f32.mrf.mxu0 }
 0x104   :  { %v810_v59 = vpop.f32.mrf.mxu1 }
 0x108   :  { %v839_v29 = vpop.f32.mrf.mxu2  ;;  %v868_v30 = vpop.f32.mrf.mxu3 }
 0x109   :  { %v840_v31 = vadd.f32 %v4914_v8, %v839_v29  ;;  %v869_v33 = vadd.f32 %v4914_v8, %v868_v30  ;;  %v1588_v30 = vld [vmem:[%s5693_s2 + $0x120] sm:$0x7f] }
 0x10b   :  { %1475 = vmatpush.bf16.xpose.msra.mxu0 %v4499_v44  ;;  %1504 = vmatpush.bf16.xpose.msra.mxu1 %v4501_v47  ;;  %v783_v32 = vpop.f32.mrf.mxu0  ;;  %v1528_v36 = vmax.f32 %v840_v31, 0.0  ;;  %v1529_v38 = vmax.f32 %v869_v33, 0.0  ;;  %v1589_v33 = vld [vmem:[%s5693_s2 + $0x128] sm:$0x7f] }
 0x10c   :  { %v812_v34 = vpop.f32.mrf.mxu1 }
 0x10d   :  { %4296 = vmatmul.msk.f32.vlgmr.msra.gmra.mxu3 %vm1594_vm0, %v1511_v24  ;;  %4294 = vmatmul.msk.f32.vlgmr.msra.gmra.mxu2 %vm1594_vm0, %v1510_v23  ;;  %v5124_v24 = vadd.f32 %v4914_v8, %v694_v3 }
 0x10e   :  { %4301 = vmatpush.xpose.msk.msra.mxu2 %vm1594_vm0, %v1556_v62  ;;  %4303 = vmatpush.xpose.msk.msra.mxu3 %vm1594_vm0, %v1557_v1 }
 0x10f   :  { %v1523_v23 = vmax.f32 %v5124_v24, 0.0  ;;  %v1582_v24 = vld [vmem:[%s5693_s2 + $0xf0] sm:$0x7f] }
 0x110   :  { %v841_v43 = vpop.f32.mrf.mxu2  ;;  %v870_v44 = vpop.f32.mrf.mxu3 }
 0x111   :  { %3140 = vrot.lane.b32.xlu0 %v1523_v23, %s4575_s9  ;;  %v1591_v43 = vld [vmem:[%s5693_s2 + $0x138] sm:$0x7f] }
 0x112   :  { %1476 = vmatmul.bf16.vlgmr.msra.gmra.mxu0 %v78_v58  ;;  %1505 = vmatmul.bf16.vlgmr.msra.gmra.mxu1 %v79_v61 }
 0x113   :  { %4307 = vmatpush.xpose.msk.msrb.mxu1 %vm1594_vm0, %v1559_v54  ;;  %4305 = vmatpush.xpose.msk.msrb.mxu0 %vm1594_vm0, %v1558_v55  ;;  %v1577_v54 = vld [vmem:[%s5693_s2 + $0xc8] sm:$0x7f]  ;;  %v1578_v55 = vld [vmem:[%s5693_s2 + $0xd0] sm:$0x7f] }
 0x115   :  { %4300 = vmatmul.msk.f32.vlgmr.msrb.gmra.mxu3 %vm1594_vm0, %v1513_v46  ;;  %4298 = vmatmul.msk.f32.vlgmr.msrb.gmra.mxu2 %vm1594_vm0, %v1512_v45  ;;  %v1564_v45 = vld [vmem:[%s5693_s2 + $0x60] sm:$0x7f]  ;;  %v1565_v46 = vld [vmem:[%s5693_s2 + $0x68] sm:$0x7f] }
 0x116   :  { %4309 = vmatpush.xpose.msk.msrb.mxu2 %vm1594_vm0, %v1560_v6  ;;  %4311 = vmatpush.xpose.msk.msrb.mxu3 %vm1594_vm0, %v1561_v9 }
 0x117   :  { %4313 = vmatpush.xpose.msk.msra.mxu0 %vm1594_vm0, %v1562_v4  ;;  %4315 = vmatpush.xpose.msk.msra.mxu1 %vm1594_vm0, %v1563_v5  ;;  %v897_v47 = vpop.f32.mrf.mxu0  ;;  %v926_v48 = vpop.f32.mrf.mxu1  ;;  %v1580_v5 = vld [vmem:[%s5693_s2 + $0xe0] sm:$0x7f] }
 0x118   :  { %v898_v49 = vadd.f32 %v4914_v8, %v897_v47  ;;  %v927_v50 = vadd.f32 %v4914_v8, %v926_v48 }
 0x119   :  { %3164 = vrot.lane.b32.xlu0 %v1524_v21, %s4575_s9 }
 0x11a   :  { %v1531_v51 = vmax.f32 %v927_v50, 0.0 }
 0x11d   :  { %4304 = vmatmul.msk.f32.vlgmr.msra.gmra.mxu3 %vm1594_vm0, %v1515_v63  ;;  %4302 = vmatmul.msk.f32.vlgmr.msra.gmra.mxu2 %vm1594_vm0, %v1514_v0  ;;  %v782_v63 = vadd.f32 %v4914_v8, %v781_v60  ;;  %v811_v0 = vadd.f32 %v4914_v8, %v810_v59  ;;  %v1586_v59 = vld [vmem:[%s5693_s2 + $0x110] sm:$0x7f] }
 0x11e   :  { %4317 = vmatpush.xpose.msk.msra.mxu2 %vm1594_vm0, %v1564_v45  ;;  %4319 = vmatpush.xpose.msk.msra.mxu3 %vm1594_vm0, %v1565_v46 }
 0x11f   :  { %v1526_v7 = vmax.f32 %v782_v63, 0.0  ;;  %v899_v62 = vpop.f32.mrf.mxu0  ;;  %v928_v2 = vpop.f32.mrf.mxu1 }
 0x120   :  { %v955_v57 = vpop.f32.mrf.mxu2  ;;  %v984_v58 = vpop.f32.mrf.mxu3 }
 0x121   :  { %3212 = vrot.lane.b32.xlu2 %v1526_v7, %s4575_s9  ;;  %3284 = vrot.lane.b32.xlu0 %v1529_v38, %s4575_s9  ;;  %v956_v61 = vadd.f32 %v4914_v8, %v955_v57  ;;  %v985_v1 = vadd.f32 %v4914_v8, %v984_v58 }
 0x122   :  { %4306 = vmatmul.msk.f32.vlgmr.msrb.gmra.mxu0 %vm1594_vm0, %v1516_v16  ;;  %4308 = vmatmul.msk.f32.vlgmr.msrb.gmra.mxu1 %vm1594_vm0, %v1517_v17  ;;  %v1527_v16 = vmax.f32 %v811_v0, 0.0  ;;  %v1570_v17 = vld [vmem:[%s5693_s2 + $0x90] sm:$0x7f] }
 0x123   :  { %4321 = vmatpush.xpose.msk.msrb.mxu0 %vm1594_vm0, %v1566_v25  ;;  %4323 = vmatpush.xpose.msk.msrb.mxu1 %vm1594_vm0, %v1567_v26  ;;  %v1532_v3 = vmax.f32 %v956_v61, 0.0  ;;  %v1533_v4 = vmax.f32 %v985_v1, 0.0 }
 0x124   :  { %3236 = vrot.lane.b32.xlu1 %v1527_v16, %s4575_s9 }
 0x125   :  { %4312 = vmatmul.msk.f32.vlgmr.msrb.gmra.mxu3 %vm1594_vm0, %v1519_v41  ;;  %4310 = vmatmul.msk.f32.vlgmr.msrb.gmra.mxu2 %vm1594_vm0, %v1518_v40  ;;  %v1573_v40 = vld [vmem:[%s5693_s2 + $0xa8] sm:$0x7f]  ;;  %v1574_v41 = vld [vmem:[%s5693_s2 + $0xb0] sm:$0x7f] }
 0x126   :  { %4325 = vmatpush.xpose.msk.msrb.mxu2 %vm1594_vm0, %v1568_v10  ;;  %4327 = vmatpush.xpose.msk.msrb.mxu3 %vm1594_vm0, %v1569_v27  ;;  %v1587_v27 = vld [vmem:[%s5693_s2 + $0x118] sm:$0x7f] }
 0x129   :  { %3332 = vrot.lane.b32.xlu2 %v1531_v51, %s4575_s9 }
 0x12a   :  { %4314 = vmatmul.msk.f32.vlgmr.msra.gmra.mxu0 %vm1594_vm0, %v1520_v52  ;;  %4316 = vmatmul.msk.f32.vlgmr.msra.gmra.mxu1 %vm1594_vm0, %v1521_v53  ;;  %v1530_v52 = vmax.f32 %v898_v49, 0.0  ;;  %v1576_v53 = vld [vmem:[%s5693_s2 + $0xc0] sm:$0x7f] }
 0x12b   :  { %4329 = vmatpush.xpose.msk.msra.mxu0 %vm1594_vm0, %v1570_v17  ;;  %4331 = vmatpush.xpose.msk.msra.mxu1 %vm1594_vm0, %v1571_v28 }
 0x12c   :  { %3260 = vrot.lane.b32.xlu1 %v1528_v36, %s4575_s9  ;;  %3308 = vrot.lane.b32.xlu0 %v1530_v52, %s4575_s9 }
 0x12d   :  { %4320 = vmatmul.msk.f32.vlgmr.msra.gmra.mxu3 %vm1594_vm0, %v1523_v23  ;;  %4318 = vmatmul.msk.f32.vlgmr.msra.gmra.mxu2 %vm1594_vm0, %v1522_v19  ;;  %v957_v19 = vpop.f32.mrf.mxu2  ;;  %v986_v23 = vpop.f32.mrf.mxu3 }
 0x12e   :  { %4333 = vmatpush.xpose.msk.msra.mxu2 %vm1594_vm0, %v1572_v39  ;;  %4335 = vmatpush.xpose.msk.msra.mxu3 %vm1594_vm0, %v1573_v40  ;;  %v2853_v19 = vpop.permute.xlu1 %2852 }
 0x12f   :  { %v1013_v6 = vpop.f32.mrf.mxu0  ;;  %v1042_v9 = vpop.f32.mrf.mxu1 }
 0x130   :  { %v1014_v11 = vadd.f32 %v4914_v8, %v1013_v6  ;;  %v1043_v12 = vadd.f32 %v4914_v8, %v1042_v9 }
 0x131   :  { %3356 = vrot.lane.b32.xlu2 %v1532_v3, %s4575_s9 }
 0x132   :  { %4322 = vmatmul.msk.f32.vlgmr.msrb.gmra.mxu0 %vm1594_vm0, %v1524_v21  ;;  %4324 = vmatmul.msk.f32.vlgmr.msrb.gmra.mxu1 %vm1594_vm0, %v1525_v22  ;;  %v1534_v14 = vmax.f32 %v1014_v11, 0.0  ;;  %v1535_v15 = vmax.f32 %v1043_v12, 0.0  ;;  %v1584_v22 = vld [vmem:[%s5693_s2 + $0x100] sm:$0x7f] }
 0x133   :  { %4337 = vmatpush.xpose.msk.msrb.mxu0 %vm1594_vm0, %v1574_v41  ;;  %4339 = vmatpush.xpose.msk.msrb.mxu1 %vm1594_vm0, %v1575_v42  ;;  %v1590_v42 = vld [vmem:[%s5693_s2 + $0x130] sm:$0x7f] }
 0x134   :  { %3380 = vrot.lane.b32.xlu1 %v1533_v4, %s4575_s9  ;;  %3428 = vrot.lane.b32.xlu0 %v1535_v15, %s4575_s9 }
 0x135   :  { %4326 = vmatmul.msk.f32.vlgmr.msrb.gmra.mxu2 %vm1594_vm0, %v1526_v7  ;;  %4328 = vmatmul.msk.f32.vlgmr.msrb.gmra.mxu3 %vm1594_vm0, %v1527_v16 }
 0x136   :  { %4341 = vmatpush.xpose.msk.msrb.mxu2 %vm1594_vm0, %v1576_v53  ;;  %4343 = vmatpush.xpose.msk.msrb.mxu3 %vm1594_vm0, %v1577_v54  ;;  %v5352_v54 = vpop.permute.xlu2 %2924 }
 0x137   :  { %v1015_v45 = vpop.f32.mrf.mxu0  ;;  %v1044_v25 = vpop.f32.mrf.mxu1 }
 0x138   :  { %v1071_v18 = vpop.f32.mrf.mxu2  ;;  %v1100_v21 = vpop.f32.mrf.mxu3 }
 0x139   :  { %v1072_v35 = vadd.f32 %v4914_v8, %v1071_v18  ;;  %v1101_v46 = vadd.f32 %v4914_v8, %v1100_v21 }
 0x13a   :  { %4330 = vmatmul.msk.f32.vlgmr.msra.gmra.mxu0 %vm1594_vm0, %v1528_v36  ;;  %4332 = vmatmul.msk.f32.vlgmr.msra.gmra.mxu1 %vm1594_vm0, %v1529_v38 }
 0x13b   :  { %4345 = vmatpush.xpose.msk.msra.mxu0 %vm1594_vm0, %v1578_v55  ;;  %4347 = vmatpush.xpose.msk.msra.mxu1 %vm1594_vm0, %v1579_v56  ;;  %v1536_v26 = vmax.f32 %v1072_v35, 0.0  ;;  %v1537_v60 = vmax.f32 %v1101_v46, 0.0  ;;  %v1593_v55 = vld [vmem:[%s5693_s2 + $0x148] sm:$0x7f]  ;;  %v1592_v56 = vld [vmem:[%s5693_s2 + $0x140] sm:$0x7f] }
 0x13c   :  { %3404 = vrot.lane.b32.xlu1 %v1534_v14, %s4575_s9  ;;  %v2788_v35 = vld [vmem:[%s5694_s3 + $0x18] sm:$0xff] }
 0x13d   :  { %4334 = vmatmul.msk.f32.vlgmr.msra.gmra.mxu2 %vm1594_vm0, %v1530_v52  ;;  %4336 = vmatmul.msk.f32.vlgmr.msra.gmra.mxu3 %vm1594_vm0, %v1531_v51 }
 0x13e   :  { %4349 = vmatpush.xpose.msk.msra.mxu2 %vm1594_vm0, %v1580_v5  ;;  %4351 = vmatpush.xpose.msk.msra.mxu3 %vm1594_vm0, %v1581_v20  ;;  %v2785_v20 = vld [vmem:[%s5694_s3] sm:$0xff]  ;;  %v5377_v9 = vpop.permute.xlu2 %2972 }
 0x13f   :  { %3476 = vrot.lane.b32.xlu2 %v1537_v60, %s4575_s9  ;;  %3452 = vrot.lane.b32.xlu0 %v1536_v26, %s4575_s9 }
 0x140   :  { %v1073_v63 = vpop.f32.mrf.mxu2  ;;  %v1102_v0 = vpop.f32.mrf.mxu3 }
 0x142   :  { %4338 = vmatmul.msk.f32.vlgmr.msrb.gmra.mxu0 %vm1594_vm0, %v1532_v3  ;;  %4340 = vmatmul.msk.f32.vlgmr.msrb.gmra.mxu1 %vm1594_vm0, %v1533_v4  ;;  %v5365_v3 = vpop.permute.xlu0 %2827 }
 0x143   :  { %4353 = vmatpush.xpose.msk.msrb.mxu0 %vm1594_vm0, %v1582_v24  ;;  %4355 = vmatpush.xpose.msk.msrb.mxu1 %vm1594_vm0, %v1583_v13  ;;  %v2786_v24 = vld [vmem:[%s5694_s3 + $0x8] sm:$0xff] }
 0x145   :  { %4342 = vmatmul.msk.f32.vlgmr.msrb.gmra.mxu2 %vm1594_vm0, %v1534_v14  ;;  %4344 = vmatmul.msk.f32.vlgmr.msrb.gmra.mxu3 %vm1594_vm0, %v1535_v15 }
 0x146   :  { %4357 = vmatpush.xpose.msk.msrb.mxu2 %vm1594_vm0, %v1584_v22  ;;  %4359 = vmatpush.xpose.msk.msrb.mxu3 %vm1594_vm0, %v1585_v37  ;;  %v2787_v22 = vld [vmem:[%s5694_s3 + $0x10] sm:$0xff]  ;;  %v5387_v37 = vpop.permute.xlu1 %2900  ;;  %v5397_v63 = vpop.permute.xlu2 %3044 }
 0x147   :  { %v1129_v7 = vpop.f32.mrf.mxu0  ;;  %v1158_v16 = vpop.f32.mrf.mxu1 }
 0x148   :  { %v1130_v10 = vadd.f32 %v4914_v8, %v1129_v7  ;;  %v1159_v17 = vadd.f32 %v4914_v8, %v1158_v16 }
 0x14a   :  { %4346 = vmatmul.msk.f32.vlgmr.msra.gmra.mxu0 %vm1594_vm0, %v1536_v26  ;;  %4348 = vmatmul.msk.f32.vlgmr.msra.gmra.mxu1 %vm1594_vm0, %v1537_v60  ;;  %v1538_v28 = vmax.f32 %v1130_v10, 0.0  ;;  %v1539_v29 = vmax.f32 %v1159_v17, 0.0  ;;  %v5379_v13 = vpop.permute.xlu0 %2876  ;;  %v2789_v10 = vld [vmem:[%s5694_s3 + $0x20] sm:$0xff]  ;;  %v2790_v17 = vld [vmem:[%s5694_s3 + $0x28] sm:$0xff] }
 0x14b   :  { %4361 = vmatpush.xpose.msk.msra.mxu0 %vm1594_vm0, %v1586_v59  ;;  %4363 = vmatpush.xpose.msk.msra.mxu1 %vm1594_vm0, %v1587_v27 }
 0x14c   :  { %3500 = vrot.lane.b32.xlu2 %v1538_v28, %s4575_s9 }
 0x14d   :  { %4350 = vmatmul.msk.f32.vlgmr.msra.gmra.mxu2 %vm1594_vm0, %v1538_v28  ;;  %4352 = vmatmul.msk.f32.vlgmr.msra.gmra.mxu3 %vm1594_vm0, %v1539_v29 }
 0x14e   :  { %4365 = vmatpush.xpose.msk.msra.mxu2 %vm1594_vm0, %v1588_v30  ;;  %4367 = vmatpush.xpose.msk.msra.mxu3 %vm1594_vm0, %v1589_v33  ;;  %v2949_v27 = vpop.permute.xlu1 %2948  ;;  %v5414_v33 = vpop.permute.xlu2 %3068 }
 0x14f   :  { %v1131_v38 = vpop.f32.mrf.mxu0  ;;  %v1160_v39 = vpop.f32.mrf.mxu1 }
 0x150   :  { %v1187_v31 = vpop.f32.mrf.mxu2  ;;  %v1216_v32 = vpop.f32.mrf.mxu3  ;;  %v2794_v39 = vld [vmem:[%s5694_s3 + $0x48] sm:$0xff] }
 0x151   :  { %v1188_v34 = vadd.f32 %v4914_v8, %v1187_v31  ;;  %v1217_v36 = vadd.f32 %v4914_v8, %v1216_v32  ;;  %v2793_v32 = vld [vmem:[%s5694_s3 + $0x40] sm:$0xff] }
 0x152   :  { %v5399_v0 = vpop.permute.xlu0 %2996 }
 0x153   :  { %v1540_v40 = vmax.f32 %v1188_v34, 0.0  ;;  %v1541_v41 = vmax.f32 %v1217_v36, 0.0 }
 0x155   :  { %3548 = vrot.lane.b32.xlu1 %v1540_v40, %s4575_s9  ;;  %4354 = vmatmul.msk.f32.vlgmr.msrb.gmra.mxu0 %vm1594_vm0, %v1540_v40 }
 0x156   :  { %4356 = vmatmul.msk.f32.vlgmr.msrb.gmra.mxu1 %vm1594_vm0, %v1541_v41  ;;  %3572 = vrot.lane.b32.xlu0 %v1541_v41, %s4575_s9 }
 0x157   :  { %4369 = vmatpush.xpose.msk.msrb.mxu0 %vm1594_vm0, %v1590_v42  ;;  %4371 = vmatpush.xpose.msk.msrb.mxu1 %vm1594_vm0, %v1591_v43  ;;  %v2791_v43 = vld [vmem:[%s5694_s3 + $0x30] sm:$0xff] }
 0x158   :  { %v1189_v44 = vpop.f32.mrf.mxu2  ;;  %v1218_v47 = vpop.f32.mrf.mxu3 }
 0x15a   :  { %v3021_v34 = vpop.permute.xlu0 %3020 }
 0x15d   :  { %3524 = vrot.lane.b32.xlu1 %v1539_v29, %s4575_s9 }
 0x15f   :  { %v1245_v48 = vpop.f32.mrf.mxu0  ;;  %v1274_v49 = vpop.f32.mrf.mxu1 }
 0x160   :  { %v1246_v50 = vadd.f32 %v4914_v8, %v1245_v48  ;;  %v1275_v51 = vadd.f32 %v4914_v8, %v1274_v49  ;;  %v5422_v40 = vpop.permute.xlu1 %3092 }
 0x162   :  { %v1542_v52 = vmax.f32 %v1246_v50, 0.0  ;;  %v1543_v53 = vmax.f32 %v1275_v51, 0.0  ;;  %v2797_v50 = vld [vmem:[%s5694_s3 + $0x60] sm:$0xff]  ;;  %v2798_v51 = vld [vmem:[%s5694_s3 + $0x68] sm:$0xff] }
 0x164   :  { %4358 = vmatmul.msk.f32.vlgmr.msrb.gmra.mxu2 %vm1594_vm0, %v1542_v52  ;;  %4360 = vmatmul.msk.f32.vlgmr.msrb.gmra.mxu3 %vm1594_vm0, %v1543_v53 }
 0x165   :  { %3596 = vrot.lane.b32.xlu0 %v1542_v52, %s4575_s9  ;;  %4375 = vmatpush.xpose.msk.msrb.mxu3 %vm1594_vm0, %v1593_v55  ;;  %v5443_v52 = vpop.permute.xlu2 %3188  ;;  %v2796_v55 = vld [vmem:[%s5694_s3 + $0x58] sm:$0xff] }
 0x166   :  { %4373 = vmatpush.xpose.msk.msrb.mxu2 %vm1594_vm0, %v1592_v56  ;;  %v2795_v56 = vld [vmem:[%s5694_s3 + $0x50] sm:$0xff] }
 0x167   :  { %v1247_v1 = vpop.f32.mrf.mxu0  ;;  %v1276_v2 = vpop.f32.mrf.mxu1 }
 0x168   :  { %v1303_v57 = vpop.f32.mrf.mxu2  ;;  %v1332_v58 = vpop.f32.mrf.mxu3 }
 0x169   :  { %v1304_v61 = vadd.f32 %v4914_v8, %v1303_v57  ;;  %v1333_v62 = vadd.f32 %v4914_v8, %v1332_v58 }
 0x16b   :  { %v1544_v4 = vmax.f32 %v1304_v61, 0.0  ;;  %v1545_v5 = vmax.f32 %v1333_v62, 0.0  ;;  %v3117_v61 = vpop.permute.xlu1 %3116 }
 0x16d   :  { %3668 = vrot.lane.b32.xlu1 %v1545_v5, %s4575_s9  ;;  %4362 = vmatmul.msk.f32.vlgmr.msra.gmra.mxu0 %vm1594_vm0, %v1544_v4 }
 0x16e   :  { %3644 = vrot.lane.b32.xlu2 %v1544_v4, %s4575_s9  ;;  %4364 = vmatmul.msk.f32.vlgmr.msra.gmra.mxu1 %vm1594_vm0, %v1545_v5  ;;  %v2802_v4 = vld [vmem:[%s5694_s3 + $0x88] sm:$0xff] }
 0x16f   :  { %2847 = vmatpush.msra.mxu0 %v2785_v20  ;;  %2871 = vmatpush.msra.mxu1 %v2786_v24 }
 0x170   :  { %v1305_v23 = vpop.f32.mrf.mxu2  ;;  %v1334_v6 = vpop.f32.mrf.mxu3 }
 0x171   :  { %v2800_v23 = vld [vmem:[%s5694_s3 + $0x78] sm:$0xff] }
 0x176   :  { %3620 = vrot.lane.b32.xlu2 %v1543_v53, %s4575_s9 }
 0x177   :  { %v1361_v11 = vpop.f32.mrf.mxu0  ;;  %v1390_v12 = vpop.f32.mrf.mxu1 }
 0x178   :  { %v1362_v14 = vadd.f32 %v4914_v8, %v1361_v11  ;;  %v1391_v15 = vadd.f32 %v4914_v8, %v1390_v12 }
 0x17a   :  { %v1546_v18 = vmax.f32 %v1362_v14, 0.0  ;;  %v1547_v21 = vmax.f32 %v1391_v15, 0.0 }
 0x17b   :  { %v3213_v20 = vpop.permute.xlu2 %3212 }
 0x17c   :  { %3692 = vrot.lane.b32.xlu1 %v1546_v18, %s4575_s9  ;;  %4366 = vmatmul.msk.f32.vlgmr.msra.gmra.mxu2 %vm1594_vm0, %v1546_v18 }
 0x17d   :  { %4368 = vmatmul.msk.f32.vlgmr.msra.gmra.mxu3 %vm1594_vm0, %v1547_v21  ;;  %2895 = vmatpush.msra.mxu2 %v2787_v22 }
 0x17e   :  { %2919 = vmatpush.msra.mxu3 %v2788_v35  ;;  %v2806_v35 = vld [vmem:[%s5694_s3 + $0xa8] sm:$0xff] }
 0x17f   :  { %v1363_v60 = vpop.f32.mrf.mxu0  ;;  %v1392_v59 = vpop.f32.mrf.mxu1 }
 0x180   :  { %v1419_v45 = vpop.f32.mrf.mxu2  ;;  %v1448_v46 = vpop.f32.mrf.mxu3  ;;  %v2804_v60 = vld [vmem:[%s5694_s3 + $0x98] sm:$0xff] }
 0x181   :  { %v1420_v25 = vadd.f32 %v4914_v8, %v1419_v45  ;;  %v1449_v26 = vadd.f32 %v4914_v8, %v1448_v46  ;;  %v2805_v45 = vld [vmem:[%s5694_s3 + $0xa0] sm:$0xff] }
 0x183   :  { %v1548_v7 = vmax.f32 %v1420_v25, 0.0  ;;  %v1549_v16 = vmax.f32 %v1449_v26, 0.0  ;;  %v3141_v53 = vpop.permute.xlu0 %3140  ;;  %v2803_v26 = vld [vmem:[%s5694_s3 + $0x90] sm:$0xff]  ;;  %v3333_v59 = vpop.permute.xlu2 %3332 }
 0x185   :  { %4370 = vmatmul.msk.f32.vlgmr.msrb.gmra.mxu0 %vm1594_vm0, %v1548_v7  ;;  %4372 = vmatmul.msk.f32.vlgmr.msrb.gmra.mxu1 %vm1594_vm0, %v1549_v16 }
 0x186   :  { %3740 = vrot.lane.b32.xlu0 %v1548_v7, %s4575_s9  ;;  %2943 = vmatpush.msrb.mxu0 %v2789_v10 }
 0x187   :  { %2967 = vmatpush.msrb.mxu1 %v2790_v17  ;;  %3764 = vrot.lane.b32.xlu2 %v1549_v16, %s4575_s9 }
 0x188   :  { %v1421_v28 = vpop.f32.mrf.mxu2  ;;  %v1450_v29 = vpop.f32.mrf.mxu3 }
 0x18b   :  { %v3165_v24 = vpop.permute.xlu0 %3164 }
 0x18d   :  { %4378 = vmatmul.msk.f32.vlgmr.msra.gmra.mxu1 %vm2829_vm1, %v2853_v19  ;;  %4377 = vmatmul.msk.f32.vlgmr.msra.gmra.mxu0 %vm2829_vm1, %v5365_v3  ;;  %v2801_v3 = vld [vmem:[%s5694_s3 + $0x80] sm:$0xff]  ;;  %v2799_v19 = vld [vmem:[%s5694_s3 + $0x70] sm:$0xff] }
 0x18e   :  { %3716 = vrot.lane.b32.xlu0 %v1547_v21, %s4575_s9  ;;  %3039 = vmatpush.msra.mxu0 %v2793_v32  ;;  %v2810_v32 = vld [vmem:[%s5694_s3 + $0xc8] sm:$0xff] }
 0x18f   :  { %v1477_v30 = vpop.f32.mrf.mxu0  ;;  %v1506_v31 = vpop.f32.mrf.mxu1  ;;  %3063 = vmatpush.msra.mxu1 %v2794_v39  ;;  %v2808_v39 = vld [vmem:[%s5694_s3 + $0xb8] sm:$0xff] }
 0x190   :  { %v1478_v36 = vadd.f32 %v4914_v8, %v1477_v30  ;;  %v1507_v38 = vadd.f32 %v4914_v8, %v1506_v31  ;;  %v2792_v8 = vld [vmem:[%s5694_s3 + $0x38] sm:$0xff]  ;;  %v1618_v44 = vpop.f32.mrf.mxu2  ;;  %v1644_v47 = vpop.f32.mrf.mxu3  ;;  %v2809_v31 = vld [vmem:[%s5694_s3 + $0xc0] sm:$0xff] }
 0x191   :  { %v2688_v57 = vsel %vm2687_vm2, %v1618_v44, 0.0  ;;  %v2689_v58 = vsel %vm2687_vm2, %v1644_v47, 0.0 }
 0x192   :  { %v1550_v41 = vmax.f32 %v1478_v36, 0.0  ;;  %v1551_v42 = vmax.f32 %v1507_v38, 0.0  ;;  %v2690_v2 = vadd.f32 %v2689_v58, %v2688_v57  ;;  %v2812_v57 = vld [vmem:[%s5694_s3 + $0xd8] sm:$0xff]  ;;  %v2811_v58 = vld [vmem:[%s5694_s3 + $0xd0] sm:$0xff] }
 0x194   :  { %4374 = vmatmul.msk.f32.vlgmr.msrb.gmra.mxu2 %vm1594_vm0, %v1550_v41  ;;  %4376 = vmatmul.msk.f32.vlgmr.msrb.gmra.mxu3 %vm1594_vm0, %v1551_v42 }
 0x195   :  { %3788 = vrot.lane.b32.xlu1 %v1550_v41, %s4575_s9  ;;  %3015 = vmatpush.msrb.mxu3 %v2792_v8 }
 0x196   :  { %2991 = vmatpush.msrb.mxu2 %v2791_v43  ;;  %3812 = vrot.lane.b32.xlu2 %v1551_v42, %s4575_s9  ;;  %v3237_v12 = vpop.permute.xlu1 %3236 }
 0x197   :  { %v1479_v48 = vpop.f32.mrf.mxu0  ;;  %v1508_v49 = vpop.f32.mrf.mxu1  ;;  %4382 = vmatmul.msk.f32.vlgmr.msrb.gmra.mxu1 %vm2829_vm1, %v2949_v27  ;;  %4381 = vmatmul.msk.f32.vlgmr.msrb.gmra.mxu0 %vm2829_vm1, %v5352_v54 }
 0x198   :  { %3135 = vmatpush.msrb.mxu0 %v2797_v50  ;;  %3159 = vmatpush.msrb.mxu1 %v2798_v51  ;;  %v1670_v62 = vpop.f32.mrf.mxu2  ;;  %v1696_v1 = vpop.f32.mrf.mxu3 }
 0x199   :  { %v2691_v54 = vsel %vm2687_vm2, %v1670_v62, 0.0  ;;  %v2693_v6 = vsel %vm2687_vm2, %v1696_v1, 0.0  ;;  %v3357_v48 = vpop.permute.xlu2 %3356 }
 0x19a   :  { %v2692_v5 = vadd.f32 %v2691_v54, %v2690_v2 }
 0x19c   :  { %4379 = vmatmul.msk.f32.vlgmr.msra.gmra.mxu2 %vm2829_vm1, %v5379_v13  ;;  %4380 = vmatmul.msk.f32.vlgmr.msra.gmra.mxu3 %vm2829_vm1, %v5387_v37  ;;  %v2694_v13 = vadd.f32 %v2693_v6, %v2692_v5  ;;  %v2816_v6 = vld [vmem:[%s5694_s3 + $0xf8] sm:$0xff] }
 0x19d   :  { %3111 = vmatpush.msra.mxu3 %v2796_v55  ;;  %3087 = vmatpush.msra.mxu2 %v2795_v56  ;;  %v2813_v55 = vld [vmem:[%s5694_s3 + $0xe0] sm:$0xff] }
 0x19e   :  { %v3261_v27 = vpop.permute.xlu1 %3260 }
 0x19f   :  { %4385 = vmatmul.msk.f32.vlgmr.msra.gmra.mxu0 %vm2829_vm1, %v3021_v34  ;;  %4386 = vmatmul.msk.f32.vlgmr.msra.gmra.mxu1 %vm2829_vm1, %v5397_v63  ;;  %v1774_v11 = vpop.f32.mrf.mxu0  ;;  %v1800_v21 = vpop.f32.mrf.mxu1 }
 0x1a0   :  { %3231 = vmatpush.msra.mxu0 %v2801_v3  ;;  %3255 = vmatpush.msra.mxu1 %v2802_v4  ;;  %v1722_v14 = vpop.f32.mrf.mxu2  ;;  %v1748_v15 = vpop.f32.mrf.mxu3  ;;  %v2699_v46 = vsel %vm2687_vm2, %v1774_v11, 0.0  ;;  %v2701_v63 = vsel %vm2687_vm2, %v1800_v21, 0.0 }
 0x1a1   :  { %v2695_v18 = vsel %vm2687_vm2, %v1722_v14, 0.0  ;;  %v2697_v37 = vsel %vm2687_vm2, %v1748_v15, 0.0  ;;  %v3477_v2 = vpop.permute.xlu2 %3476  ;;  %v2817_v15 = vld [vmem:[%s5694_s3 + $0x100] sm:$0xff] }
 0x1a2   :  { %v2696_v22 = vadd.f32 %v2695_v18, %v2694_v13  ;;  %v2818_v18 = vld [vmem:[%s5694_s3 + $0x108] sm:$0xff] }
 0x1a4   :  { %4383 = vmatmul.msk.f32.vlgmr.msrb.gmra.mxu2 %vm2829_vm1, %v5377_v9  ;;  %4384 = vmatmul.msk.f32.vlgmr.msrb.gmra.mxu3 %vm2829_vm1, %v5399_v0  ;;  %v2698_v9 = vadd.f32 %v2697_v37, %v2696_v22  ;;  %v3285_v0 = vpop.permute.xlu0 %3284 }
 0x1a5   :  { %3183 = vmatpush.msrb.mxu2 %v2799_v19  ;;  %3207 = vmatpush.msrb.mxu3 %v2800_v23  ;;  %v2815_v23 = vld [vmem:[%s5694_s3 + $0xf0] sm:$0xff] }
 0x1a6   :  { %v2700_v25 = vadd.f32 %v2699_v46, %v2698_v9  ;;  %v3381_v47 = vpop.permute.xlu1 %3380  ;;  %v2820_v9 = vld [vmem:[%s5694_s3 + $0x118] sm:$0xff] }
 0x1a7   :  { %4389 = vmatmul.msk.f32.vlgmr.msrb.gmra.mxu0 %vm2829_vm1, %v3117_v61  ;;  %4390 = vmatmul.msk.f32.vlgmr.msrb.gmra.mxu1 %vm2829_vm1, %v3141_v53  ;;  %v1878_v17 = vpop.f32.mrf.mxu0 }
 0x1a8   :  { %3351 = vmatpush.msrb.mxu1 %v2806_v35  ;;  %3327 = vmatpush.msrb.mxu0 %v2805_v45  ;;  %v1826_v7 = vpop.f32.mrf.mxu2  ;;  %v2702_v16 = vadd.f32 %v2701_v63, %v2700_v25  ;;  %v1852_v10 = vpop.f32.mrf.mxu3  ;;  %v2707_v36 = vsel %vm2687_vm2, %v1878_v17, 0.0  ;;  %v2819_v45 = vld [vmem:[%s5694_s3 + $0x110] sm:$0xff] }
 0x1a9   :  { %v2703_v28 = vsel %vm2687_vm2, %v1826_v7, 0.0  ;;  %v2705_v30 = vsel %vm2687_vm2, %v1852_v10, 0.0  ;;  %v3501_v21 = vpop.permute.xlu2 %3500 }
 0x1aa   :  { %v2704_v29 = vadd.f32 %v2703_v28, %v2702_v16  ;;  %v2821_v16 = vld [vmem:[%s5694_s3 + $0x120] sm:$0xff]  ;;  %v2823_v28 = vld [vmem:[%s5694_s3 + $0x130] sm:$0xff] }
 0x1ac   :  { %4387 = vmatmul.msk.f32.vlgmr.msra.gmra.mxu2 %vm2829_vm1, %v5414_v33  ;;  %4388 = vmatmul.msk.f32.vlgmr.msra.gmra.mxu3 %vm2829_vm1, %v5422_v40  ;;  %v1904_v33 = vpop.f32.mrf.mxu1  ;;  %v2706_v34 = vadd.f32 %v2705_v30, %v2704_v29  ;;  %v2807_v40 = vld [vmem:[%s5694_s3 + $0xb0] sm:$0xff]  ;;  %v3309_v50 = vpop.permute.xlu0 %3308  ;;  %v2824_v29 = vld [vmem:[%s5694_s3 + $0x138] sm:$0xff] }
 0x1ad   :  { %3279 = vmatpush.msra.mxu2 %v2803_v26  ;;  %3303 = vmatpush.msra.mxu3 %v2804_v60  ;;  %v2709_v41 = vsel %vm2687_vm2, %v1904_v33, 0.0 }
 0x1ae   :  { %v2708_v38 = vadd.f32 %v2707_v36, %v2706_v34  ;;  %v3405_v3 = vpop.permute.xlu1 %3404 }
 0x1af   :  { %4393 = vmatmul.msk.f32.vlgmr.msra.gmra.mxu0 %vm2829_vm1, %v3213_v20  ;;  %4394 = vmatmul.msk.f32.vlgmr.msra.gmra.mxu1 %vm2829_vm1, %v3237_v12  ;;  %v1982_v51 = vpop.f32.mrf.mxu0  ;;  %v2814_v20 = vld [vmem:[%s5694_s3 + $0xe8] sm:$0xff] }
 0x1b0   :  { %3423 = vmatpush.msra.mxu0 %v2809_v31  ;;  %3447 = vmatpush.msra.mxu1 %v2810_v32  ;;  %v1930_v42 = vpop.f32.mrf.mxu2  ;;  %v2710_v8 = vadd.f32 %v2709_v41, %v2708_v38  ;;  %v1956_v43 = vpop.f32.mrf.mxu3 }
 0x1b1   :  { %v2711_v44 = vsel %vm2687_vm2, %v1930_v42, 0.0  ;;  %v2713_v53 = vsel %vm2687_vm2, %v1956_v43, 0.0 }
 0x1b2   :  { %v2712_v49 = vadd.f32 %v2711_v44, %v2710_v8 }
 0x1b4   :  { %4391 = vmatmul.msk.f32.vlgmr.msrb.gmra.mxu2 %vm2829_vm1, %v3165_v24  ;;  %4392 = vmatmul.msk.f32.vlgmr.msrb.gmra.mxu3 %vm2829_vm1, %v5443_v52  ;;  %v2714_v56 = vadd.f32 %v2713_v53, %v2712_v49  ;;  %v2715_v52 = vsel %vm2687_vm2, %v1982_v51, 0.0  ;;  %v2008_v61 = vpop.f32.mrf.mxu1  ;;  %v3429_v5 = vpop.permute.xlu0 %3428  ;;  %v2826_v53 = vld [vmem:[%s5694_s3 + $0x148] sm:$0xff] }
 0x1b5   :  { %3399 = vmatpush.msrb.mxu3 %v2808_v39  ;;  %3375 = vmatpush.msrb.mxu2 %v2807_v40  ;;  %v2717_v54 = vsel %vm2687_vm2, %v2008_v61, 0.0  ;;  %v2822_v40 = vld [vmem:[%s5694_s3 + $0x128] sm:$0xff] }
 0x1b6   :  { %v2716_v62 = vadd.f32 %v2715_v52, %v2714_v56 }
 0x1b7   :  { %4398 = vmatmul.msk.f32.vlgmr.msrb.gmra.mxu1 %vm2829_vm1, %v3333_v59  ;;  %4397 = vmatmul.msk.f32.vlgmr.msrb.gmra.mxu0 %vm2829_vm1, %v3309_v50  ;;  %v2086_v13 = vpop.f32.mrf.mxu0 }
 0x1b8   :  { %3519 = vmatpush.msrb.mxu0 %v2813_v55  ;;  %v2034_v1 = vpop.f32.mrf.mxu2  ;;  %v2718_v4 = vadd.f32 %v2717_v54, %v2716_v62  ;;  %3543 = vmatpush.msrb.mxu1 %v2814_v20  ;;  %v2060_v19 = vpop.f32.mrf.mxu3  ;;  %v2723_v35 = vsel %vm2687_vm2, %v2086_v13, 0.0 }
 0x1b9   :  { %v2719_v24 = vsel %vm2687_vm2, %v2034_v1, 0.0  ;;  %v2721_v12 = vsel %vm2687_vm2, %v2060_v19, 0.0 }
 0x1ba   :  { %v2720_v11 = vadd.f32 %v2719_v24, %v2718_v4 }
 0x1bc   :  { %4395 = vmatmul.msk.f32.vlgmr.msra.gmra.mxu2 %vm2829_vm1, %v3261_v27  ;;  %4396 = vmatmul.msk.f32.vlgmr.msra.gmra.mxu3 %vm2829_vm1, %v3285_v0  ;;  %v2722_v14 = vadd.f32 %v2721_v12, %v2720_v11  ;;  %v2112_v22 = vpop.f32.mrf.mxu1  ;;  %v3453_v37 = vpop.permute.xlu0 %3452 }
 0x1bd   :  { %3495 = vmatpush.msra.mxu3 %v2812_v57  ;;  %3471 = vmatpush.msra.mxu2 %v2811_v58  ;;  %v2725_v25 = vsel %vm2687_vm2, %v2112_v22, 0.0 }
 0x1be   :  { %v2724_v46 = vadd.f32 %v2723_v35, %v2722_v14 }
 0x1bf   :  { %4401 = vmatmul.msk.f32.vlgmr.msra.gmra.mxu0 %vm2829_vm1, %v3405_v3  ;;  %4402 = vmatmul.msk.f32.vlgmr.msra.gmra.mxu1 %vm2829_vm1, %v3429_v5  ;;  %v2190_v17 = vpop.f32.mrf.mxu0 }
 0x1c0   :  { %3615 = vmatpush.msra.mxu0 %v2817_v15  ;;  %3639 = vmatpush.msra.mxu1 %v2818_v18  ;;  %v2138_v26 = vpop.f32.mrf.mxu2  ;;  %v2726_v60 = vadd.f32 %v2725_v25, %v2724_v46  ;;  %v2164_v63 = vpop.f32.mrf.mxu3  ;;  %v2731_v32 = vsel %vm2687_vm2, %v2190_v17, 0.0 }
 0x1c1   :  { %v2727_v59 = vsel %vm2687_vm2, %v2138_v26, 0.0  ;;  %v2729_v7 = vsel %vm2687_vm2, %v2164_v63, 0.0 }
 0x1c2   :  { %v2728_v0 = vadd.f32 %v2727_v59, %v2726_v60 }
 0x1c4   :  { %4399 = vmatmul.msk.f32.vlgmr.msrb.gmra.mxu2 %vm2829_vm1, %v3357_v48  ;;  %4400 = vmatmul.msk.f32.vlgmr.msrb.gmra.mxu3 %vm2829_vm1, %v3381_v47  ;;  %v2730_v10 = vadd.f32 %v2729_v7, %v2728_v0  ;;  %v2216_v31 = vpop.f32.mrf.mxu1  ;;  %v2825_v47 = vld [vmem:[%s5694_s3 + $0x140] sm:$0xff] }
 0x1c5   :  { %3567 = vmatpush.msrb.mxu2 %v2815_v23  ;;  %3591 = vmatpush.msrb.mxu3 %v2816_v6  ;;  %v2733_v36 = vsel %vm2687_vm2, %v2216_v31, 0.0 }
 0x1c6   :  { %v2732_v33 = vadd.f32 %v2731_v32, %v2730_v10 }
 0x1c7   :  { %4405 = vmatmul.msk.f32.vlgmr.msrb.gmra.mxu0 %vm2829_vm1, %v3501_v21  ;;  %v3549_v27 = vpop.permute.xlu1 %3548  ;;  %v2294_v48 = vpop.f32.mrf.mxu0 }
 0x1c8   :  { %3711 = vmatpush.msrb.mxu0 %v2821_v16  ;;  %v3573_v30 = vpop.permute.xlu0 %3572  ;;  %v2242_v34 = vpop.f32.mrf.mxu2  ;;  %v2734_v41 = vadd.f32 %v2733_v36, %v2732_v33  ;;  %v2739_v51 = vsel %vm2687_vm2, %v2294_v48, 0.0 }
 0x1c9   :  { %v3645_v38 = vpop.permute.xlu2 %3644  ;;  %v2735_v39 = vsel %vm2687_vm2, %v2242_v34, 0.0  ;;  %v2268_v42 = vpop.f32.mrf.mxu3 }
 0x1ca   :  { %v2736_v43 = vadd.f32 %v2735_v39, %v2734_v41  ;;  %v2737_v44 = vsel %vm2687_vm2, %v2268_v42, 0.0 }
 0x1cc   :  { %4403 = vmatmul.msk.f32.vlgmr.msra.gmra.mxu2 %vm2829_vm1, %v3453_v37  ;;  %4404 = vmatmul.msk.f32.vlgmr.msra.gmra.mxu3 %vm2829_vm1, %v3477_v2  ;;  %v2738_v50 = vadd.f32 %v2737_v44, %v2736_v43  ;;  %v2320_v55 = vpop.f32.mrf.mxu1 }
 0x1cd   :  { %3663 = vmatpush.msra.mxu2 %v2819_v45  ;;  %3687 = vmatpush.msra.mxu3 %v2820_v9  ;;  %v2741_v61 = vsel %vm2687_vm2, %v2320_v55, 0.0 }
 0x1ce   :  { %v2740_v52 = vadd.f32 %v2739_v51, %v2738_v50 }
 0x1cf   :  { %v3525_v8 = vpop.permute.xlu1 %3524 }
 0x1d0   :  { %4406 = vmatmul.msk.f32.vlgmr.msrb.gmra.mxu1 %vm2829_vm1, %v3525_v8  ;;  %v2346_v57 = vpop.f32.mrf.mxu2  ;;  %v2742_v1 = vadd.f32 %v2741_v61, %v2740_v52  ;;  %v4510_v8 = vld [vmem:[%s5695_s4 + $0x3] ss:$0 sm:$0xff] }
 0x1d1   :  { %3735 = vmatpush.msrb.mxu1 %v2822_v40  ;;  %v3621_v56 = vpop.permute.xlu2 %3620  ;;  %v2743_v62 = vsel %vm2687_vm2, %v2346_v57, 0.0  ;;  %v2372_v54 = vpop.f32.mrf.mxu3 }
 0x1d2   :  { %v2744_v2 = vadd.f32 %v2743_v62, %v2742_v1  ;;  %v2745_v4 = vsel %vm2687_vm2, %v2372_v54, 0.0  ;;  %v2398_v20 = vpop.f32.mrf.mxu0 }
 0x1d3   :  { %v2747_v23 = vsel %vm2687_vm2, %v2398_v20, 0.0 }
 0x1d4   :  { %4407 = vmatmul.msk.f32.vlgmr.msrb.gmra.mxu2 %vm2829_vm1, %v3549_v27  ;;  %4408 = vmatmul.msk.f32.vlgmr.msrb.gmra.mxu3 %vm2829_vm1, %v3573_v30  ;;  %v2746_v5 = vadd.f32 %v2745_v4, %v2744_v2  ;;  %v2424_v19 = vpop.f32.mrf.mxu1 }
 0x1d5   :  { %3759 = vmatpush.msrb.mxu2 %v2823_v28  ;;  %3783 = vmatpush.msrb.mxu3 %v2824_v29  ;;  %v2749_v12 = vsel %vm2687_vm2, %v2424_v19, 0.0 }
 0x1d6   :  { %v2748_v6 = vadd.f32 %v2747_v23, %v2746_v5 }
 0x1d7   :  { %v3597_v49 = vpop.permute.xlu0 %3596 }
 0x1d8   :  { %4409 = vmatmul.msk.f32.vlgmr.msra.gmra.mxu0 %vm2829_vm1, %v3597_v49  ;;  %4410 = vmatmul.msk.f32.vlgmr.msra.gmra.mxu1 %vm2829_vm1, %v3621_v56  ;;  %v2750_v14 = vadd.f32 %v2749_v12, %v2748_v6 }
 0x1d9   :  { %3807 = vmatpush.msra.mxu0 %v2825_v47  ;;  %3831 = vmatpush.msra.mxu1 %v2826_v53 }
 0x1dc   :  { %4411 = vmatmul.msk.f32.vlgmr.msra.gmra.mxu2 %vm2829_vm1, %v3645_v38 }
 0x1df   :  { %v3669_v58 = vpop.permute.xlu1 %3668 }
 0x1e0   :  { %4412 = vmatmul.msk.f32.vlgmr.msra.gmra.mxu3 %vm2829_vm1, %v3669_v58 }
 0x1e1   :  { %v3765_v3 = vpop.permute.xlu2 %3764 }
 0x1e7   :  { %v2450_v11 = vpop.f32.mrf.mxu2  ;;  %v2476_v15 = vpop.f32.mrf.mxu3 }
 0x1e8   :  { %4416 = vmatmul.msk.f32.vlgmr.msrb.gmra.mxu3 %vm2829_vm1, %v3765_v3  ;;  %v2751_v13 = vsel %vm2687_vm2, %v2450_v11, 0.0  ;;  %v2753_v37 = vsel %vm2687_vm2, %v2476_v15, 0.0 }
 0x1e9   :  { %v2752_v21 = vadd.f32 %v2751_v13, %v2750_v14 }
 0x1ea   :  { %v2502_v22 = vpop.f32.mrf.mxu0 }
 0x1eb   :  { %v2754_v35 = vadd.f32 %v2753_v37, %v2752_v21  ;;  %v2528_v45 = vpop.f32.mrf.mxu1  ;;  %v2755_v9 = vsel %vm2687_vm2, %v2502_v22, 0.0 }
 0x1ec   :  { %v2757_v60 = vsel %vm2687_vm2, %v2528_v45, 0.0 }
 0x1ed   :  { %v2756_v25 = vadd.f32 %v2755_v9, %v2754_v35 }
 0x1ee   :  { %v3693_v24 = vpop.permute.xlu1 %3692 }
 0x1ef   :  { %4413 = vmatmul.msk.f32.vlgmr.msrb.gmra.mxu0 %vm2829_vm1, %v3693_v24  ;;  %v2758_v7 = vadd.f32 %v2757_v60, %v2756_v25 }
 0x1f0   :  { %v3813_v17 = vpop.permute.xlu2 %3812 }
 0x1f8   :  { %v3741_v18 = vpop.permute.xlu0 %3740 }
 0x1f9   :  { %4415 = vmatmul.msk.f32.vlgmr.msrb.gmra.mxu2 %vm2829_vm1, %v3741_v18 }
 0x1ff   :  { %v2554_v26 = vpop.f32.mrf.mxu2 }
 0x200   :  { %v3717_v46 = vpop.permute.xlu0 %3716  ;;  %v2759_v0 = vsel %vm2687_vm2, %v2554_v26, 0.0  ;;  %v2580_v16 = vpop.f32.mrf.mxu3 }
 0x201   :  { %4414 = vmatmul.msk.f32.vlgmr.msrb.gmra.mxu1 %vm2829_vm1, %v3717_v46  ;;  %v2760_v27 = vadd.f32 %v2759_v0, %v2758_v7  ;;  %v2761_v28 = vsel %vm2687_vm2, %v2580_v16, 0.0 }
 0x202   :  { %v2606_v59 = vpop.f32.mrf.mxu0  ;;  %v2632_v10 = vpop.f32.mrf.mxu1 }
 0x203   :  { %v2762_v29 = vadd.f32 %v2761_v28, %v2760_v27  ;;  %v2763_v31 = vsel %vm2687_vm2, %v2606_v59, 0.0  ;;  %v2765_v33 = vsel %vm2687_vm2, %v2632_v10, 0.0 }
 0x205   :  { %v2764_v32 = vadd.f32 %v2763_v31, %v2762_v29 }
 0x207   :  { %v3789_v63 = vpop.permute.xlu1 %3788  ;;  %v2766_v38 = vadd.f32 %v2765_v33, %v2764_v32 }
 0x208   :  { %4417 = vmatmul.msk.f32.vlgmr.msra.gmra.mxu0 %vm2829_vm1, %v3789_v63 }
 0x209   :  { %4418 = vmatmul.msk.f32.vlgmr.msra.gmra.mxu1 %vm2829_vm1, %v3813_v17 }
 0x20a   :  { %v2849_v30 = vpop.f32.mrf.mxu0  ;;  %v2873_v34 = vpop.f32.mrf.mxu1 }
 0x20b   :  { %v3836_v47 = vsel %vm1594_vm0, %v2849_v30, 0.0  ;;  %v3837_v48 = vsel %vm1594_vm0, %v2873_v34, 0.0 }
 0x20c   :  { %v3838_v51 = vadd.f32 %v3837_v48, %v3836_v47 }
 0x214   :  { %v2945_v43 = vpop.f32.mrf.mxu0  ;;  %v2969_v50 = vpop.f32.mrf.mxu1 }
 0x215   :  { %v3843_v62 = vsel %vm1594_vm0, %v2945_v43, 0.0  ;;  %v3845_v2 = vsel %vm1594_vm0, %v2969_v50, 0.0 }
 0x217   :  { %v2658_v36 = vpop.f32.mrf.mxu2  ;;  %v2684_v39 = vpop.f32.mrf.mxu3 }
 0x218   :  { %v2767_v40 = vsel %vm2687_vm2, %v2658_v36, 0.0  ;;  %v2769_v41 = vsel %vm2687_vm2, %v2684_v39, 0.0 }
 0x219   :  { %v2768_v42 = vadd.f32 %v2767_v40, %v2766_v38 }
 0x21b   :  { %v2770_v44 = vadd.f32 %v2769_v41, %v2768_v42 }
 0x21c   :  { %v3041_v1 = vpop.f32.mrf.mxu0  ;;  %v3065_v24 = vpop.f32.mrf.mxu1 }
 0x21d   :  { %v5631_v49 = vadd.f32 %v4510_v8, %v2770_v44  ;;  %v3851_v11 = vsel %vm1594_vm0, %v3041_v1, 0.0  ;;  %v3853_v13 = vsel %vm1594_vm0, %v3065_v24, 0.0 }
 0x21f   :  { %v2897_v53 = vpop.f32.mrf.mxu2  ;;  %v2921_v55 = vpop.f32.mrf.mxu3  ;;  %v2774_v56 = vsel %vm2687_vm2, %v5631_v49, -inf }
 0x220   :  { %v3839_v52 = vsel %vm1594_vm0, %v2897_v53, 0.0  ;;  %2775 = vmax.xlane.f32.xlu0 %v2774_v56  ;;  %v3841_v58 = vsel %vm1594_vm0, %v2921_v55, 0.0 }
 0x221   :  { %v3840_v57 = vadd.f32 %v3839_v52, %v3838_v51 }
 0x223   :  { %v3842_v61 = vadd.f32 %v3841_v58, %v3840_v57 }
 0x224   :  { %v3137_v14 = vpop.f32.mrf.mxu0  ;;  %v3161_v45 = vpop.f32.mrf.mxu1 }
 0x225   :  { %v3844_v54 = vadd.f32 %v3843_v62, %v3842_v61  ;;  %v3859_v46 = vsel %vm1594_vm0, %v3137_v14, 0.0  ;;  %v3861_v26 = vsel %vm1594_vm0, %v3161_v45, 0.0 }
 0x227   :  { %v2993_v3 = vpop.f32.mrf.mxu2  ;;  %v3846_v4 = vadd.f32 %v3845_v2, %v3844_v54  ;;  %v3017_v5 = vpop.f32.mrf.mxu3 }
 0x228   :  { %v3847_v20 = vsel %vm1594_vm0, %v2993_v3, 0.0  ;;  %v3849_v23 = vsel %vm1594_vm0, %v3017_v5, 0.0 }
 0x229   :  { %v3848_v19 = vadd.f32 %v3847_v20, %v3846_v4 }
 0x22b   :  { %v3850_v6 = vadd.f32 %v3849_v23, %v3848_v19 }
 0x22c   :  { %v3233_v7 = vpop.f32.mrf.mxu0  ;;  %v3257_v28 = vpop.f32.mrf.mxu1 }
 0x22d   :  { %v3852_v12 = vadd.f32 %v3851_v11, %v3850_v6  ;;  %v3867_v27 = vsel %vm1594_vm0, %v3233_v7, 0.0  ;;  %v3869_v30 = vsel %vm1594_vm0, %v3257_v28, 0.0 }
 0x22f   :  { %v3089_v15 = vpop.f32.mrf.mxu2  ;;  %v3854_v18 = vadd.f32 %v3853_v13, %v3852_v12  ;;  %v3113_v21 = vpop.f32.mrf.mxu3 }
 0x230   :  { %v3855_v22 = vsel %vm1594_vm0, %v3089_v15, 0.0  ;;  %v3857_v35 = vsel %vm1594_vm0, %v3113_v21, 0.0 }
 0x231   :  { %v3856_v37 = vadd.f32 %v3855_v22, %v3854_v18 }
 0x233   :  { %v3858_v9 = vadd.f32 %v3857_v35, %v3856_v37 }
 0x234   :  { %v3329_v39 = vpop.f32.mrf.mxu0  ;;  %v3353_v42 = vpop.f32.mrf.mxu1 }
 0x235   :  { %v3860_v25 = vadd.f32 %v3859_v46, %v3858_v9  ;;  %v3875_v41 = vsel %vm1594_vm0, %v3329_v39, 0.0  ;;  %v3877_v44 = vsel %vm1594_vm0, %v3353_v42, 0.0 }
 0x237   :  { %v3185_v60 = vpop.f32.mrf.mxu2  ;;  %v3862_v59 = vadd.f32 %v3861_v26, %v3860_v25  ;;  %v3209_v63 = vpop.f32.mrf.mxu3 }
 0x238   :  { %v3863_v0 = vsel %vm1594_vm0, %v3185_v60, 0.0  ;;  %v3865_v10 = vsel %vm1594_vm0, %v3209_v63, 0.0 }
 0x239   :  { %v3864_v16 = vadd.f32 %v3863_v0, %v3862_v59 }
 0x23b   :  { %v3866_v17 = vadd.f32 %v3865_v10, %v3864_v16 }
 0x23c   :  { %v3425_v56 = vpop.f32.mrf.mxu0  ;;  %v3449_v52 = vpop.f32.mrf.mxu1 }
 0x23d   :  { %v3868_v29 = vadd.f32 %v3867_v27, %v3866_v17  ;;  %v3883_v57 = vsel %vm1594_vm0, %v3425_v56, 0.0  ;;  %v3885_v61 = vsel %vm1594_vm0, %v3449_v52, 0.0 }
 0x23f   :  { %v3281_v31 = vpop.f32.mrf.mxu2  ;;  %v3870_v32 = vadd.f32 %v3869_v30, %v3868_v29  ;;  %v3305_v34 = vpop.f32.mrf.mxu3 }
 0x240   :  { %v3871_v33 = vsel %vm1594_vm0, %v3281_v31, 0.0  ;;  %v3873_v38 = vsel %vm1594_vm0, %v3305_v34, 0.0 }
 0x241   :  { %v3872_v36 = vadd.f32 %v3871_v33, %v3870_v32 }
 0x243   :  { %v3874_v40 = vadd.f32 %v3873_v38, %v3872_v36 }
 0x244   :  { %v3521_v5 = vpop.f32.mrf.mxu0 }
 0x245   :  { %v3876_v8 = vadd.f32 %v3875_v41, %v3874_v40  ;;  %v3891_v19 = vsel %vm1594_vm0, %v3521_v5, 0.0  ;;  %v4511_v41 = vld [vmem:[%s5695_s4 + $0x1] ss:$0 sm:$0xff] }
 0x247   :  { %v3377_v43 = vpop.f32.mrf.mxu2  ;;  %v3878_v47 = vadd.f32 %v3877_v44, %v3876_v8  ;;  %v3401_v51 = vpop.f32.mrf.mxu3  ;;  %v4512_v44 = vld [vmem:[%s5695_s4 + $0x2] ss:$0 sm:$0xff] }
 0x248   :  { %v3879_v48 = vsel %vm1594_vm0, %v3377_v43, 0.0  ;;  %v3881_v53 = vsel %vm1594_vm0, %v3401_v51, 0.0 }
 0x249   :  { %v3880_v50 = vadd.f32 %v3879_v48, %v3878_v47 }
 0x24b   :  { %v3882_v55 = vadd.f32 %v3881_v53, %v3880_v50 }
 0x24d   :  { %v3884_v58 = vadd.f32 %v3883_v57, %v3882_v55  ;;  %v3545_v24 = vpop.f32.mrf.mxu1  ;;  %v4513_v57 = vld [vmem:[%s5695_s4 + $0x4] ss:$0 sm:$0xff] }
 0x24e   :  { %v3893_v23 = vsel %vm1594_vm0, %v3545_v24, 0.0 }
 0x24f   :  { %v3473_v62 = vpop.f32.mrf.mxu2  ;;  %v3886_v1 = vadd.f32 %v3885_v61, %v3884_v58  ;;  %v3497_v3 = vpop.f32.mrf.mxu3 }
 0x250   :  { %v3887_v54 = vsel %vm1594_vm0, %v3473_v62, 0.0  ;;  %v3889_v4 = vsel %vm1594_vm0, %v3497_v3, 0.0 }
 0x251   :  { %v3888_v2 = vadd.f32 %v3887_v54, %v3886_v1 }
 0x253   :  { %v3890_v20 = vadd.f32 %v3889_v4, %v3888_v2 }
 0x255   :  { %v3892_v6 = vadd.f32 %v3891_v19, %v3890_v20  ;;  %v3617_v21 = vpop.f32.mrf.mxu0  ;;  %v3641_v35 = vpop.f32.mrf.mxu1 }
 0x256   :  { %v3899_v37 = vsel %vm1594_vm0, %v3617_v21, 0.0  ;;  %v3901_v9 = vsel %vm1594_vm0, %v3641_v35, 0.0 }
 0x257   :  { %v3894_v11 = vadd.f32 %v3893_v23, %v3892_v6  ;;  %v3569_v12 = vpop.f32.mrf.mxu2  ;;  %v3593_v13 = vpop.f32.mrf.mxu3 }
 0x258   :  { %v3895_v14 = vsel %vm1594_vm0, %v3569_v12, 0.0  ;;  %v3897_v18 = vsel %vm1594_vm0, %v3593_v13, 0.0 }
 0x259   :  { %v3896_v15 = vadd.f32 %v3895_v14, %v3894_v11 }
 0x25b   :  { %v3898_v22 = vadd.f32 %v3897_v18, %v3896_v15 }
 0x25d   :  { %v3900_v45 = vadd.f32 %v3899_v37, %v3898_v22 }
 0x25f   :  { %v3665_v25 = vpop.f32.mrf.mxu2  ;;  %v3902_v26 = vadd.f32 %v3901_v9, %v3900_v45 }
 0x260   :  { %v3903_v59 = vsel %vm1594_vm0, %v3665_v25, 0.0 }
 0x261   :  { %v3904_v0 = vadd.f32 %v3903_v59, %v3902_v26 }
 0x263   :  { %v3689_v46 = vpop.f32.mrf.mxu3 }
 0x264   :  { %v3905_v63 = vsel %vm1594_vm0, %v3689_v46, 0.0 }
 0x265   :  { %v3906_v16 = vadd.f32 %v3905_v63, %v3904_v0 }
 0x26b   :  { %v3785_v10 = vpop.f32.mrf.mxu3 }
 0x26c   :  { %v3713_v60 = vpop.f32.mrf.mxu0  ;;  %v3913_v32 = vsel %vm1594_vm0, %v3785_v10, 0.0 }
 0x26d   :  { %v3907_v7 = vsel %vm1594_vm0, %v3713_v60, 0.0 }
 0x26e   :  { %v3908_v17 = vadd.f32 %v3907_v7, %v3906_v16 }
 0x27c   :  { %v3761_v27 = vpop.f32.mrf.mxu2 }
 0x27d   :  { %v3911_v31 = vsel %vm1594_vm0, %v3761_v27, 0.0 }
 0x27e   :  { %v3737_v28 = vpop.f32.mrf.mxu1 }
 0x27f   :  { %v3909_v29 = vsel %vm1594_vm0, %v3737_v28, 0.0 }
 0x280   :  { %v3910_v30 = vadd.f32 %v3909_v29, %v3908_v17 }
 0x282   :  { %v3912_v34 = vadd.f32 %v3911_v31, %v3910_v30 }
 0x284   :  { %v3914_v38 = vadd.f32 %v3913_v32, %v3912_v34 }
 0x285   :  { %v3809_v33 = vpop.f32.mrf.mxu0 }
 0x286   :  { %v3915_v36 = vsel %vm1594_vm0, %v3809_v33, 0.0  ;;  %v3833_v40 = vpop.f32.mrf.mxu1 }
 0x287   :  { %v3916_v39 = vadd.f32 %v3915_v36, %v3914_v38  ;;  %v3917_v42 = vsel %vm1594_vm0, %v3833_v40, 0.0 }
 0x289   :  { %v3918_v8 = vadd.f32 %v3917_v42, %v3916_v39 }
 0x28b   :  { %v3921_v43 = vadd.f32 %v4511_v41, %v3918_v8 }
 0x28d   :  { %v3922_v47 = vmax.f32 %v3921_v43, 0.0 }
 0x28f   :  { %v3925_v48 = vmul.f32 %v4512_v44, %v3922_v47 }
 0x291   :  { %v3926_v53 = vsel %vm1594_vm0, %v3925_v48, 0.0 }
 0x292   :  { %3927 = vadd.xlane.f32.xlu1 %v3926_v53 }
 0x293   :  { %v2776_v50 = vpop.xlane.xlu0 %2775 }
 0x294   :  { %v2777_v51 = vsub.f32 %v5631_v49, %v2776_v50 }
 0x296   :  { %v2778_v55 = vmul.f32 1.442695, %v2777_v51 }
 0x298   :  { %4514 = vpow2.f32 %v2778_v55 }
 0x29e   :  { %v4515_v56 = vpop.eup %4514 }
 0x29f   :  { %v2780_v52 = vsel %vm2687_vm2, %v4515_v56, 0.0 }
 0x2a0   :  { %2781 = vadd.xlane.f32.xlu2 %v2780_v52 }
 0x305   :  { %v3928_v58 = vpop.xlane.xlu1 %3927 }
 0x306   :  { %v3931_v61 = vadd.f32 %v4513_v57, %v3928_v58 }
 0x308   :  { %4516 = vtanh.f32 %v3931_v61 }
 0x30e   :  { %v4517_v62 = vpop.eup %4516 }
 0x30f   :  { %3935 = vrot.lane.b32.xlu2 %v4517_v62, %s4576_s1 }
 0x313   :  { %v2782_v49 = vpop.xlane.xlu2 %2781 }
 0x314   :  { %4518 = vrcp.f32 %v2782_v49 }
 0x31a   :  { %v4519_v1 = vpop.eup %4518 }
 0x31b   :  { %v2784_v54 = vmul.f32 %v4519_v1, %v4515_v56 }
 0x31d   :  { %3933 = vst.msk [vmem:[#allocation5] sm:$0xff] %vm2687_vm2, %v2784_v54 }
 0x369   :  { %v3936_v2 = vpop.permute.xlu2 %3935 }
 0x36a   :  { %3939 = vst.msk [vmem:[#allocation5] sm:$0xff] %vm3938_vm3, %v3936_v2 }
 0x36b   :  { %3950 = dma.vmem_to_hbm [thread:$0]  %s3946_s8, 128, %s3948_s12, [#allocation4]  }
 0x36c   :  { %4570 = dma.done.wait [#allocation4], 128  }
 0x36d   :  { %4571 = vsyncadd [#allocation4], 4294967168 }
 0x36e   :  { %3955 = vsyncpa [#allocation3], 1 }
 0x36f   :  { %3956 = vsyncpa [#allocation4], 1 }

</bundles_post_ra>
